<compile_context>
chip_gen: v7x
topology: tpu7x:2x2x1
jax: 0.10.0
libtpu: 0.0.40
codegen_flags: <defaults>
</compile_context>

<pallas_src>
import functools

import jax
import jax.numpy as jnp
from jax.experimental import pallas as pl
from jax.experimental.pallas import tpu as pltpu


_VMEM_LIMIT_BYTES = 28 * 1024 * 1024  # valid on v5e/v6e (128 MiB) and v7x (64 MiB)


def _round_up(x, m):
    return -(-x // m) * m


# ----------------------------- Pallas kernels ------------------------------ #

def _conv3x3_relu_kernel(x_ref, w_ref, b_ref, o_ref, acc_ref, *, wp):
    # x_ref : (L, Cin)   bf16, flattened zero-padded row window, L=(tile_h+3)*wp
    # w_ref : (9, Cin, Cout) bf16
    # b_ref : (1, Cout)  f32
    # o_ref : (M, Cout)  bf16, M = tile_h * wp (last 2 cols per row are padding)
    # acc_ref: (M, Cout) f32 VMEM scratch accumulator
    m = o_ref.shape[0]
    acc_ref[...] = jnp.zeros_like(acc_ref)
    for kh in range(3):                     # static unroll over the 9 conv taps
        for kw in range(3):
            off = kh * wp + kw
            tap = x_ref[off:off + m, :]     # (M, Cin) contiguous static slice
            acc_ref[...] += jnp.dot(tap, w_ref[kh * 3 + kw],
                                    preferred_element_type=jnp.float32)
    y = jnp.maximum(acc_ref[...] + b_ref[...], 0.0)
    o_ref[...] = y.astype(o_ref.dtype)


def _maxpool2x2_kernel(x_ref, o_ref):
    # x_ref: (tile_ho, 2, Wo, 2, C); o_ref: (tile_ho, Wo, C)
    p00 = x_ref[:, 0, :, 0, :]
    p01 = x_ref[:, 0, :, 1, :]
    p10 = x_ref[:, 1, :, 0, :]
    p11 = x_ref[:, 1, :, 1, :]
    o_ref[...] = jnp.maximum(jnp.maximum(p00, p01), jnp.maximum(p10, p11))


# ----------------------------- Tile selection ------------------------------- #

def _pick_conv_tile_h(H, W, cin, cout, budget=20 * 1024 * 1024):
    """Largest divisor of H whose working set (with lane padding) fits budget."""
    wp = W + 2
    cin_p = _round_up(cin, 128)
    cout_p = _round_up(cout, 128)
    w_bytes = 2 * (9 * cin_p * cout_p * 2)            # bf16 weights, 2 buffers
    best = 1
    for th in range(1, H + 1):
        if H % th:
            continue
        in_b = 2 * ((th + 3) * wp * cin_p * 2)        # bf16 input window, 2 buf
        out_b = 2 * (th * wp * cout_p * 2)            # bf16 output, 2 buffers
        acc_b = th * wp * cout_p * 4                  # f32 accumulator scratch
        if w_bytes + in_b + out_b + acc_b <= budget:
            best = th
    return best


def _pick_pool_tile_h(Ho, Wo, C, budget=12 * 1024 * 1024):
    c_p = _round_up(C, 128)
    best = 1
    for t in range(1, Ho + 1):
        if Ho % t:
            continue
        in_b = 2 * (t * 2 * Wo * 8 * c_p * 2)   # (2,C)-minor tiles pad 2->8 sublanes
        out_b = 2 * (t * Wo * c_p * 2)
        if in_b + out_b <= budget:
            best = t
    return best


# ------------------------------- Wrappers ---------------------------------- #

def conv3x3_relu(x, w, b):
    """x: (N,H,W,Cin) bf16; w: (3,3,Cin,Cout) bf16; b: (Cout,) f32.

    Returns ReLU(conv2d(x, w, padding=1, stride=1) + b) as (N,H,W,Cout) bf16.
    """
    N, H, W, Cin = x.shape
    Cout = w.shape[-1]
    Wp = W + 2
    th = _pick_conv_tile_h(H, W, Cin, Cout)
    nT = H // th
    L = (th + 3) * Wp          # tile_h rows + 2-row halo + 1 slack padded row
    M = th * Wp                # outputs per tile (incl. 2 padding cols per row)

    # Zero-pad (H: 1 top + 2 bottom for slack, W: 1 left + 1 right), flatten HxW.
    xp = jnp.pad(x, ((0, 0), (1, 2), (1, 1), (0, 0)))
    xpf = xp.reshape(N, (H + 3) * Wp, Cin)
    if nT == 1:
        xw = xpf[:, None]                                      # (N, 1, L, Cin)
    else:
        xw = jnp.stack([xpf[:, t * th * Wp: t * th * Wp + L]
                        for t in range(nT)], axis=1)           # (N, nT, L, Cin)

    w9 = w.reshape(9, Cin, Cout)
    b2 = b.reshape(1, Cout).astype(jnp.float32)

    flops = 2 * N * nT * M * 9 * Cin * Cout
    bytes_accessed = int(xw.size * 2 + w9.size * 2 + b2.size * 4
                         + N * nT * M * Cout * 2)

    out = pl.pallas_call(
        functools.partial(_conv3x3_relu_kernel, wp=Wp),
        out_shape=jax.ShapeDtypeStruct((N, nT, M, Cout), jnp.bfloat16),
        grid=(N, nT),
        in_specs=[
            pl.BlockSpec((None, None, L, Cin), lambda n, t: (n, t, 0, 0)),
            pl.BlockSpec((9, Cin, Cout), lambda n, t: (0, 0, 0)),
            pl.BlockSpec((1, Cout), lambda n, t: (0, 0)),
        ],
        out_specs=pl.BlockSpec((None, None, M, Cout), lambda n, t: (n, t, 0, 0)),
        scratch_shapes=[pltpu.VMEM((M, Cout), jnp.float32)],
        compiler_params=pltpu.CompilerParams(
            dimension_semantics=("parallel", "parallel"),
            vmem_limit_bytes=_VMEM_LIMIT_BYTES),
        cost_estimate=pl.CostEstimate(flops=int(flops), transcendentals=0,
                                      bytes_accessed=bytes_accessed),
    )(xw, w9, b2)

    # Drop the 2 padding columns of each row and restore (N, H, W, Cout).
    out = out.reshape(N, nT, th, Wp, Cout)[:, :, :, :W, :]
    return out.reshape(N, H, W, Cout)


def maxpool2x2(x):
    """x: (N, H, W, C); 2x2 max-pool, stride 2 -> (N, H//2, W//2, C)."""
    N, H, W, C = x.shape
    Ho, Wo = H // 2, W // 2
    tho = _pick_pool_tile_h(Ho, Wo, C)
    nT = Ho // tho
    xr = x.reshape(N, Ho, 2, Wo, 2, C)
    return pl.pallas_call(
        _maxpool2x2_kernel,
        out_shape=jax.ShapeDtypeStruct((N, Ho, Wo, C), x.dtype),
        grid=(N, nT),
        in_specs=[pl.BlockSpec((None, tho, 2, Wo, 2, C),
                               lambda n, t: (n, t, 0, 0, 0, 0))],
        out_specs=pl.BlockSpec((None, tho, Wo, C), lambda n, t: (n, t, 0, 0)),
        compiler_params=pltpu.CompilerParams(
            dimension_semantics=("parallel", "parallel"),
            vmem_limit_bytes=_VMEM_LIMIT_BYTES),
    )(xr)


# --------------------------- VGG19 slices model ----------------------------- #

# Channel spec of the 13 conv layers reached by features[0:30], in order.
_CONV_SPECS = [
    (3, 64),                                           # slice1
    (64, 64), (64, 128),                               # slice2
    (128, 128), (128, 256),                            # slice3
    (256, 256), (256, 256), (256, 256), (256, 512),    # slice4
    (512, 512), (512, 512), (512, 512), (512, 512),    # slice5
]

# Per-slice op program: ('c', conv_index) or ('p',) for maxpool.
_SLICE_OPS = [
    [('c', 0)],
    [('c', 1), ('p',), ('c', 2)],
    [('c', 3), ('p',), ('c', 4)],
    [('c', 5), ('c', 6), ('c', 7), ('p',), ('c', 8)],
    [('c', 9), ('c', 10), ('c', 11), ('p',), ('c', 12)],
]


def init_vgg19_params(key):
    # TODO(synk): torchvision pretrained VGG19 weights not loaded; deterministic
    # He-style init with the correct shapes is used instead (bf16 weights).
    params = []
    for i, (cin, cout) in enumerate(_CONV_SPECS):
        kw_key = jax.random.fold_in(key, i)
        fan_in = 9 * cin
        w = (jax.random.normal(kw_key, (3, 3, cin, cout), jnp.float32)
             * jnp.sqrt(2.0 / fan_in)).astype(jnp.bfloat16)
        b = jnp.zeros((cout,), jnp.float32)
        params.append((w, b))
    return params


def vgg19_forward(params, x_nchw):
    """Mirrors VGG19.forward: returns [h_relu1 .. h_relu5], each NCHW f32."""
    h = jnp.transpose(x_nchw, (0, 2, 3, 1)).astype(jnp.bfloat16)  # NCHW -> NHWC
    outs = []
    for ops in _SLICE_OPS:
        for op in ops:
            if op[0] == 'c':
                w, b = params[op[1]]
                h = conv3x3_relu(h, w, b)
            else:
                h = maxpool2x2(h)
        outs.append(jnp.transpose(h, (0, 3, 1, 2)).astype(jnp.float32))
    return outs


# ------------------------------ References ---------------------------------- #

def _conv3x3_relu_ref(x, w, b):
    y = jax.lax.conv_general_dilated(
        x.astype(jnp.float32), w.astype(jnp.float32), (1, 1),
        ((1, 1), (1, 1)), dimension_numbers=("NHWC", "HWIO", "NHWC"))
    return jnp.maximum(y + b[None, None, None, :], 0.0)


# ---------------------------------- Main ------------------------------------ #

if __name__ == "__main__":
    key = jax.random.PRNGKey(0)
    k_param, k_input, k_cx, k_cw, k_px = jax.random.split(key, 5)

    # Unit checks of the two kernels against pure-JAX references.
    xc = jax.random.normal(k_cx, (2, 8, 8, 16), jnp.float32).astype(jnp.bfloat16)
    wc = (jax.random.normal(k_cw, (3, 3, 16, 32), jnp.float32) * 0.1
          ).astype(jnp.bfloat16)
    bc = jnp.linspace(-0.5, 0.5, 32, dtype=jnp.float32)
    y = jax.block_until_ready(conv3x3_relu(xc, wc, bc)).astype(jnp.float32)
    y_ref = _conv3x3_relu_ref(xc, wc, bc)
    assert bool(jnp.allclose(y, y_ref, atol=5e-2, rtol=5e-2)), \
        float(jnp.max(jnp.abs(y - y_ref)))

    xpool = jax.random.normal(k_px, (2, 8, 8, 32), jnp.float32).astype(jnp.bfloat16)
    p = jax.block_until_ready(maxpool2x2(xpool)).astype(jnp.float32)
    p_ref = jnp.max(xpool.reshape(2, 4, 2, 4, 2, 32), axis=(2, 4)).astype(jnp.float32)
    assert bool(jnp.allclose(p, p_ref)), "maxpool mismatch"

    # Full VGG19 feature-slice forward.
    params = init_vgg19_params(k_param)
    x = jax.random.normal(k_input, (2, 3, 16, 16), jnp.float32)  # NCHW input
    fwd = jax.jit(functools.partial(vgg19_forward, params))
    outs = [jax.block_until_ready(o) for o in fwd(x)]

    expected_shapes = [(2, 64, 16, 16), (2, 128, 8, 8), (2, 256, 4, 4),
                       (2, 512, 2, 2), (2, 512, 1, 1)]
    assert [tuple(o.shape) for o in outs] == expected_shapes, \
        [tuple(o.shape) for o in outs]
    assert all(bool(jnp.all(jnp.isfinite(o))) for o in outs)

    print("KERNEL_OK")
</pallas_src>

<mosaic_0001>
module attributes {stable_mosaic.version = 11 : i64} {
  func.func @_conv3x3_relu_kernel(%arg0: i32, %arg1: i32, %arg2: memref<1x1x110x16xbf16, #tpu.memory_space<vmem>>, %arg3: memref<9x16x32xbf16, #tpu.memory_space<vmem>>, %arg4: memref<1x32xf32, #tpu.memory_space<vmem>>, %arg5: memref<1x1x80x32xbf16, #tpu.memory_space<vmem>>, %arg6: memref<80x32xf32, #tpu.memory_space<vmem>>) attributes {dimension_semantics = [#tpu.dimension_semantics<parallel>, #tpu.dimension_semantics<parallel>], iteration_bounds = array<i64: 2, 1>, scalar_prefetch = 0 : i64, scratch_operands = 1 : i64, tpu.core_type = #tpu.core_type<tc>, window_params = [{transform_indices = @transform_0, window_bounds = array<i64: 1, 1, 110, 16>}, {pipeline_mode = #tpu.pipeline_mode<synchronous>, transform_indices = @transform_1, window_bounds = array<i64: 9, 16, 32>}, {pipeline_mode = #tpu.pipeline_mode<synchronous>, transform_indices = @transform_2, window_bounds = array<i64: 1, 32>}, {transform_indices = @transform_3, window_bounds = array<i64: 1, 1, 80, 32>}]} {
    %cst = arith.constant 0.000000e+00 : f32
    %0 = vector.broadcast %cst : f32 to vector<80x32xf32>
    %c0 = arith.constant 0 : index
    %c0_0 = arith.constant 0 : index
    %1 = vector.load %arg6[%c0, %c0_0] : memref<80x32xf32, #tpu.memory_space<vmem>>, vector<80x32xf32>
    tpu.vector_store %arg6[%c0, %c0_0], %0 {strides = array<i32>} : memref<80x32xf32, #tpu.memory_space<vmem>>, vector<80x32xf32>,
    %c0_1 = arith.constant 0 : index
    %c0_2 = arith.constant 0 : index
    %c0_3 = arith.constant 0 : index
    %c0_4 = arith.constant 0 : index
    %2 = vector.load %arg2[%c0_1, %c0_2, %c0_3, %c0_4] : memref<1x1x110x16xbf16, #tpu.memory_space<vmem>>, vector<1x1x80x16xbf16>
    %3 = vector.shape_cast %2 : vector<1x1x80x16xbf16> to vector<80x16xbf16>
    %c0_5 = arith.constant 0 : index
    %c0_6 = arith.constant 0 : index
    %4 = vector.load %arg6[%c0_5, %c0_6] : memref<80x32xf32, #tpu.memory_space<vmem>>, vector<80x32xf32>
    %c0_7 = arith.constant 0 : index
    %c0_8 = arith.constant 0 : index
    %c0_9 = arith.constant 0 : index
    %5 = vector.load %arg3[%c0_7, %c0_8, %c0_9] : memref<9x16x32xbf16, #tpu.memory_space<vmem>>, vector<1x16x32xbf16>
    %6 = vector.shape_cast %5 : vector<1x16x32xbf16> to vector<16x32xbf16>
    %cst_10 = arith.constant dense<0.000000e+00> : vector<80x32xf32>
    %7 = tpu.matmul %3, %6, %cst_10 {dimension_numbers = #tpu.dot_dimension_numbers<[1], [0], [0], [1], [0, 0, 1, 1], [], []>} : vector<80x16xbf16>, vector<16x32xbf16>, vector<80x32xf32> -> vector<80x32xf32>
    %8 = arith.addf %4, %7 : vector<80x32xf32>
    %c0_11 = arith.constant 0 : index
    %c0_12 = arith.constant 0 : index
    %9 = vector.load %arg6[%c0_11, %c0_12] : memref<80x32xf32, #tpu.memory_space<vmem>>, vector<80x32xf32>
    tpu.vector_store %arg6[%c0_11, %c0_12], %8 {strides = array<i32>} : memref<80x32xf32, #tpu.memory_space<vmem>>, vector<80x32xf32>,
    %c0_13 = arith.constant 0 : index
    %c0_14 = arith.constant 0 : index
    %c1 = arith.constant 1 : index
    %c0_15 = arith.constant 0 : index
    %10 = vector.load %arg2[%c0_13, %c0_14, %c1, %c0_15] : memref<1x1x110x16xbf16, #tpu.memory_space<vmem>>, vector<1x1x80x16xbf16>
    %11 = vector.shape_cast %10 : vector<1x1x80x16xbf16> to vector<80x16xbf16>
    %c0_16 = arith.constant 0 : index
    %c0_17 = arith.constant 0 : index
    %12 = vector.load %arg6[%c0_16, %c0_17] : memref<80x32xf32, #tpu.memory_space<vmem>>, vector<80x32xf32>
    %c1_18 = arith.constant 1 : index
    %c0_19 = arith.constant 0 : index
    %c0_20 = arith.constant 0 : index
    %13 = vector.load %arg3[%c1_18, %c0_19, %c0_20] : memref<9x16x32xbf16, #tpu.memory_space<vmem>>, vector<1x16x32xbf16>
    %14 = vector.shape_cast %13 : vector<1x16x32xbf16> to vector<16x32xbf16>
    %cst_21 = arith.constant dense<0.000000e+00> : vector<80x32xf32>
    %15 = tpu.matmul %11, %14, %cst_21 {dimension_numbers = #tpu.dot_dimension_numbers<[1], [0], [0], [1], [0, 0, 1, 1], [], []>} : vector<80x16xbf16>, vector<16x32xbf16>, vector<80x32xf32> -> vector<80x32xf32>
    %16 = arith.addf %12, %15 : vector<80x32xf32>
    %c0_22 = arith.constant 0 : index
    %c0_23 = arith.constant 0 : index
    %17 = vector.load %arg6[%c0_22, %c0_23] : memref<80x32xf32, #tpu.memory_space<vmem>>, vector<80x32xf32>
    tpu.vector_store %arg6[%c0_22, %c0_23], %16 {strides = array<i32>} : memref<80x32xf32, #tpu.memory_space<vmem>>, vector<80x32xf32>,
    %c0_24 = arith.constant 0 : index
    %c0_25 = arith.constant 0 : index
    %c2 = arith.constant 2 : index
    %c0_26 = arith.constant 0 : index
    %18 = vector.load %arg2[%c0_24, %c0_25, %c2, %c0_26] : memref<1x1x110x16xbf16, #tpu.memory_space<vmem>>, vector<1x1x80x16xbf16>
    %19 = vector.shape_cast %18 : vector<1x1x80x16xbf16> to vector<80x16xbf16>
    %c0_27 = arith.constant 0 : index
    %c0_28 = arith.constant 0 : index
    %20 = vector.load %arg6[%c0_27, %c0_28] : memref<80x32xf32, #tpu.memory_space<vmem>>, vector<80x32xf32>
    %c2_29 = arith.constant 2 : index
    %c0_30 = arith.constant 0 : index
    %c0_31 = arith.constant 0 : index
    %21 = vector.load %arg3[%c2_29, %c0_30, %c0_31] : memref<9x16x32xbf16, #tpu.memory_space<vmem>>, vector<1x16x32xbf16>
    %22 = vector.shape_cast %21 : vector<1x16x32xbf16> to vector<16x32xbf16>
    %cst_32 = arith.constant dense<0.000000e+00> : vector<80x32xf32>
    %23 = tpu.matmul %19, %22, %cst_32 {dimension_numbers = #tpu.dot_dimension_numbers<[1], [0], [0], [1], [0, 0, 1, 1], [], []>} : vector<80x16xbf16>, vector<16x32xbf16>, vector<80x32xf32> -> vector<80x32xf32>
    %24 = arith.addf %20, %23 : vector<80x32xf32>
    %c0_33 = arith.constant 0 : index
    %c0_34 = arith.constant 0 : index
    %25 = vector.load %arg6[%c0_33, %c0_34] : memref<80x32xf32, #tpu.memory_space<vmem>>, vector<80x32xf32>
    tpu.vector_store %arg6[%c0_33, %c0_34], %24 {strides = array<i32>} : memref<80x32xf32, #tpu.memory_space<vmem>>, vector<80x32xf32>,
    %c0_35 = arith.constant 0 : index
    %c0_36 = arith.constant 0 : index
    %c10 = arith.constant 10 : index
    %c0_37 = arith.constant 0 : index
    %26 = vector.load %arg2[%c0_35, %c0_36, %c10, %c0_37] : memref<1x1x110x16xbf16, #tpu.memory_space<vmem>>, vector<1x1x80x16xbf16>
    %27 = vector.shape_cast %26 : vector<1x1x80x16xbf16> to vector<80x16xbf16>
    %c0_38 = arith.constant 0 : index
    %c0_39 = arith.constant 0 : index
    %28 = vector.load %arg6[%c0_38, %c0_39] : memref<80x32xf32, #tpu.memory_space<vmem>>, vector<80x32xf32>
    %c3 = arith.constant 3 : index
    %c0_40 = arith.constant 0 : index
    %c0_41 = arith.constant 0 : index
    %29 = vector.load %arg3[%c3, %c0_40, %c0_41] : memref<9x16x32xbf16, #tpu.memory_space<vmem>>, vector<1x16x32xbf16>
    %30 = vector.shape_cast %29 : vector<1x16x32xbf16> to vector<16x32xbf16>
    %cst_42 = arith.constant dense<0.000000e+00> : vector<80x32xf32>
    %31 = tpu.matmul %27, %30, %cst_42 {dimension_numbers = #tpu.dot_dimension_numbers<[1], [0], [0], [1], [0, 0, 1, 1], [], []>} : vector<80x16xbf16>, vector<16x32xbf16>, vector<80x32xf32> -> vector<80x32xf32>
    %32 = arith.addf %28, %31 : vector<80x32xf32>
    %c0_43 = arith.constant 0 : index
    %c0_44 = arith.constant 0 : index
    %33 = vector.load %arg6[%c0_43, %c0_44] : memref<80x32xf32, #tpu.memory_space<vmem>>, vector<80x32xf32>
    tpu.vector_store %arg6[%c0_43, %c0_44], %32 {strides = array<i32>} : memref<80x32xf32, #tpu.memory_space<vmem>>, vector<80x32xf32>,
    %c0_45 = arith.constant 0 : index
    %c0_46 = arith.constant 0 : index
    %c11 = arith.constant 11 : index
    %c0_47 = arith.constant 0 : index
    %34 = vector.load %arg2[%c0_45, %c0_46, %c11, %c0_47] : memref<1x1x110x16xbf16, #tpu.memory_space<vmem>>, vector<1x1x80x16xbf16>
    %35 = vector.shape_cast %34 : vector<1x1x80x16xbf16> to vector<80x16xbf16>
    %c0_48 = arith.constant 0 : index
    %c0_49 = arith.constant 0 : index
    %36 = vector.load %arg6[%c0_48, %c0_49] : memref<80x32xf32, #tpu.memory_space<vmem>>, vector<80x32xf32>
    %c4 = arith.constant 4 : index
    %c0_50 = arith.constant 0 : index
    %c0_51 = arith.constant 0 : index
    %37 = vector.load %arg3[%c4, %c0_50, %c0_51] : memref<9x16x32xbf16, #tpu.memory_space<vmem>>, vector<1x16x32xbf16>
    %38 = vector.shape_cast %37 : vector<1x16x32xbf16> to vector<16x32xbf16>
    %cst_52 = arith.constant dense<0.000000e+00> : vector<80x32xf32>
    %39 = tpu.matmul %35, %38, %cst_52 {dimension_numbers = #tpu.dot_dimension_numbers<[1], [0], [0], [1], [0, 0, 1, 1], [], []>} : vector<80x16xbf16>, vector<16x32xbf16>, vector<80x32xf32> -> vector<80x32xf32>
    %40 = arith.addf %36, %39 : vector<80x32xf32>
    %c0_53 = arith.constant 0 : index
    %c0_54 = arith.constant 0 : index
    %41 = vector.load %arg6[%c0_53, %c0_54] : memref<80x32xf32, #tpu.memory_space<vmem>>, vector<80x32xf32>
    tpu.vector_store %arg6[%c0_53, %c0_54], %40 {strides = array<i32>} : memref<80x32xf32, #tpu.memory_space<vmem>>, vector<80x32xf32>,
    %c0_55 = arith.constant 0 : index
    %c0_56 = arith.constant 0 : index
    %c12 = arith.constant 12 : index
    %c0_57 = arith.constant 0 : index
    %42 = vector.load %arg2[%c0_55, %c0_56, %c12, %c0_57] : memref<1x1x110x16xbf16, #tpu.memory_space<vmem>>, vector<1x1x80x16xbf16>
    %43 = vector.shape_cast %42 : vector<1x1x80x16xbf16> to vector<80x16xbf16>
    %c0_58 = arith.constant 0 : index
    %c0_59 = arith.constant 0 : index
    %44 = vector.load %arg6[%c0_58, %c0_59] : memref<80x32xf32, #tpu.memory_space<vmem>>, vector<80x32xf32>
    %c5 = arith.constant 5 : index
    %c0_60 = arith.constant 0 : index
    %c0_61 = arith.constant 0 : index
    %45 = vector.load %arg3[%c5, %c0_60, %c0_61] : memref<9x16x32xbf16, #tpu.memory_space<vmem>>, vector<1x16x32xbf16>
    %46 = vector.shape_cast %45 : vector<1x16x32xbf16> to vector<16x32xbf16>
    %cst_62 = arith.constant dense<0.000000e+00> : vector<80x32xf32>
    %47 = tpu.matmul %43, %46, %cst_62 {dimension_numbers = #tpu.dot_dimension_numbers<[1], [0], [0], [1], [0, 0, 1, 1], [], []>} : vector<80x16xbf16>, vector<16x32xbf16>, vector<80x32xf32> -> vector<80x32xf32>
    %48 = arith.addf %44, %47 : vector<80x32xf32>
    %c0_63 = arith.constant 0 : index
    %c0_64 = arith.constant 0 : index
    %49 = vector.load %arg6[%c0_63, %c0_64] : memref<80x32xf32, #tpu.memory_space<vmem>>, vector<80x32xf32>
    tpu.vector_store %arg6[%c0_63, %c0_64], %48 {strides = array<i32>} : memref<80x32xf32, #tpu.memory_space<vmem>>, vector<80x32xf32>,
    %c0_65 = arith.constant 0 : index
    %c0_66 = arith.constant 0 : index
    %c20 = arith.constant 20 : index
    %c0_67 = arith.constant 0 : index
    %50 = vector.load %arg2[%c0_65, %c0_66, %c20, %c0_67] : memref<1x1x110x16xbf16, #tpu.memory_space<vmem>>, vector<1x1x80x16xbf16>
    %51 = vector.shape_cast %50 : vector<1x1x80x16xbf16> to vector<80x16xbf16>
    %c0_68 = arith.constant 0 : index
    %c0_69 = arith.constant 0 : index
    %52 = vector.load %arg6[%c0_68, %c0_69] : memref<80x32xf32, #tpu.memory_space<vmem>>, vector<80x32xf32>
    %c6 = arith.constant 6 : index
    %c0_70 = arith.constant 0 : index
    %c0_71 = arith.constant 0 : index
    %53 = vector.load %arg3[%c6, %c0_70, %c0_71] : memref<9x16x32xbf16, #tpu.memory_space<vmem>>, vector<1x16x32xbf16>
    %54 = vector.shape_cast %53 : vector<1x16x32xbf16> to vector<16x32xbf16>
    %cst_72 = arith.constant dense<0.000000e+00> : vector<80x32xf32>
    %55 = tpu.matmul %51, %54, %cst_72 {dimension_numbers = #tpu.dot_dimension_numbers<[1], [0], [0], [1], [0, 0, 1, 1], [], []>} : vector<80x16xbf16>, vector<16x32xbf16>, vector<80x32xf32> -> vector<80x32xf32>
    %56 = arith.addf %52, %55 : vector<80x32xf32>
    %c0_73 = arith.constant 0 : index
    %c0_74 = arith.constant 0 : index
    %57 = vector.load %arg6[%c0_73, %c0_74] : memref<80x32xf32, #tpu.memory_space<vmem>>, vector<80x32xf32>
    tpu.vector_store %arg6[%c0_73, %c0_74], %56 {strides = array<i32>} : memref<80x32xf32, #tpu.memory_space<vmem>>, vector<80x32xf32>,
    %c0_75 = arith.constant 0 : index
    %c0_76 = arith.constant 0 : index
    %c21 = arith.constant 21 : index
    %c0_77 = arith.constant 0 : index
    %58 = vector.load %arg2[%c0_75, %c0_76, %c21, %c0_77] : memref<1x1x110x16xbf16, #tpu.memory_space<vmem>>, vector<1x1x80x16xbf16>
    %59 = vector.shape_cast %58 : vector<1x1x80x16xbf16> to vector<80x16xbf16>
    %c0_78 = arith.constant 0 : index
    %c0_79 = arith.constant 0 : index
    %60 = vector.load %arg6[%c0_78, %c0_79] : memref<80x32xf32, #tpu.memory_space<vmem>>, vector<80x32xf32>
    %c7 = arith.constant 7 : index
    %c0_80 = arith.constant 0 : index
    %c0_81 = arith.constant 0 : index
    %61 = vector.load %arg3[%c7, %c0_80, %c0_81] : memref<9x16x32xbf16, #tpu.memory_space<vmem>>, vector<1x16x32xbf16>
    %62 = vector.shape_cast %61 : vector<1x16x32xbf16> to vector<16x32xbf16>
    %cst_82 = arith.constant dense<0.000000e+00> : vector<80x32xf32>
    %63 = tpu.matmul %59, %62, %cst_82 {dimension_numbers = #tpu.dot_dimension_numbers<[1], [0], [0], [1], [0, 0, 1, 1], [], []>} : vector<80x16xbf16>, vector<16x32xbf16>, vector<80x32xf32> -> vector<80x32xf32>
    %64 = arith.addf %60, %63 : vector<80x32xf32>
    %c0_83 = arith.constant 0 : index
    %c0_84 = arith.constant 0 : index
    %65 = vector.load %arg6[%c0_83, %c0_84] : memref<80x32xf32, #tpu.memory_space<vmem>>, vector<80x32xf32>
    tpu.vector_store %arg6[%c0_83, %c0_84], %64 {strides = array<i32>} : memref<80x32xf32, #tpu.memory_space<vmem>>, vector<80x32xf32>,
    %c0_85 = arith.constant 0 : index
    %c0_86 = arith.constant 0 : index
    %c22 = arith.constant 22 : index
    %c0_87 = arith.constant 0 : index
    %66 = vector.load %arg2[%c0_85, %c0_86, %c22, %c0_87] : memref<1x1x110x16xbf16, #tpu.memory_space<vmem>>, vector<1x1x80x16xbf16>
    %67 = vector.shape_cast %66 : vector<1x1x80x16xbf16> to vector<80x16xbf16>
    %c0_88 = arith.constant 0 : index
    %c0_89 = arith.constant 0 : index
    %68 = vector.load %arg6[%c0_88, %c0_89] : memref<80x32xf32, #tpu.memory_space<vmem>>, vector<80x32xf32>
    %c8 = arith.constant 8 : index
    %c0_90 = arith.constant 0 : index
    %c0_91 = arith.constant 0 : index
    %69 = vector.load %arg3[%c8, %c0_90, %c0_91] : memref<9x16x32xbf16, #tpu.memory_space<vmem>>, vector<1x16x32xbf16>
    %70 = vector.shape_cast %69 : vector<1x16x32xbf16> to vector<16x32xbf16>
    %cst_92 = arith.constant dense<0.000000e+00> : vector<80x32xf32>
    %71 = tpu.matmul %67, %70, %cst_92 {dimension_numbers = #tpu.dot_dimension_numbers<[1], [0], [0], [1], [0, 0, 1, 1], [], []>} : vector<80x16xbf16>, vector<16x32xbf16>, vector<80x32xf32> -> vector<80x32xf32>
    %72 = arith.addf %68, %71 : vector<80x32xf32>
    %c0_93 = arith.constant 0 : index
    %c0_94 = arith.constant 0 : index
    %73 = vector.load %arg6[%c0_93, %c0_94] : memref<80x32xf32, #tpu.memory_space<vmem>>, vector<80x32xf32>
    tpu.vector_store %arg6[%c0_93, %c0_94], %72 {strides = array<i32>} : memref<80x32xf32, #tpu.memory_space<vmem>>, vector<80x32xf32>,
    %c0_95 = arith.constant 0 : index
    %c0_96 = arith.constant 0 : index
    %74 = vector.load %arg6[%c0_95, %c0_96] : memref<80x32xf32, #tpu.memory_space<vmem>>, vector<80x32xf32>
    %c0_97 = arith.constant 0 : index
    %c0_98 = arith.constant 0 : index
    %75 = vector.load %arg4[%c0_97, %c0_98] : memref<1x32xf32, #tpu.memory_space<vmem>>, vector<1x32xf32>
    %76 = vector.broadcast %75 : vector<1x32xf32> to vector<80x32xf32>
    %77 = arith.addf %74, %76 : vector<80x32xf32>
    %cst_99 = arith.constant 0.000000e+00 : f32
    %78 = vector.broadcast %cst_99 : f32 to vector<80x32xf32>
    %79 = arith.maximumf %77, %78 : vector<80x32xf32>
    %80 = arith.truncf %79 : vector<80x32xf32> to vector<80x32xbf16>
    %c0_100 = arith.constant 0 : index
    %c0_101 = arith.constant 0 : index
    %c0_102 = arith.constant 0 : index
    %c0_103 = arith.constant 0 : index
    %81 = vector.load %arg5[%c0_100, %c0_101, %c0_102, %c0_103] : memref<1x1x80x32xbf16, #tpu.memory_space<vmem>>, vector<1x1x80x32xbf16>
    %82 = vector.shape_cast %81 : vector<1x1x80x32xbf16> to vector<80x32xbf16>
    %83 = vector.shape_cast %80 : vector<80x32xbf16> to vector<1x1x80x32xbf16>
    tpu.vector_store %arg5[%c0_100, %c0_101, %c0_102, %c0_103], %83 {strides = array<i32>} : memref<1x1x80x32xbf16, #tpu.memory_space<vmem>>, vector<1x1x80x32xbf16>,
    return
  }
  func.func @transform_0(%arg0: i32, %arg1: i32) -> (i32, i32, i32, i32) {
    %c0_i32 = arith.constant 0 : i32
    %c0_i32_0 = arith.constant 0 : i32
    %c0_i32_1 = arith.constant 0 : i32
    return %arg0, %arg1, %c0_i32, %c0_i32_0 : i32, i32, i32, i32
  }
  func.func @transform_1(%arg0: i32, %arg1: i32) -> (i32, i32, i32) {
    %c0_i32 = arith.constant 0 : i32
    %c0_i32_0 = arith.constant 0 : i32
    %c0_i32_1 = arith.constant 0 : i32
    %c0_i32_2 = arith.constant 0 : i32
    return %c0_i32, %c0_i32_0, %c0_i32_1 : i32, i32, i32
  }
  func.func @transform_2(%arg0: i32, %arg1: i32) -> (i32, i32) {
    %c0_i32 = arith.constant 0 : i32
    %c0_i32_0 = arith.constant 0 : i32
    %c0_i32_1 = arith.constant 0 : i32
    return %c0_i32, %c0_i32_0 : i32, i32
  }
  func.func @transform_3(%arg0: i32, %arg1: i32) -> (i32, i32, i32, i32) {
    %c0_i32 = arith.constant 0 : i32
    %c0_i32_0 = arith.constant 0 : i32
    %c0_i32_1 = arith.constant 0 : i32
    return %arg0, %arg1, %c0_i32, %c0_i32_0 : i32, i32, i32, i32
  }
}

</mosaic_0001>

<bundles_post_ra>
// kernel: tpu_custom_call.1
= control target key start
LH: loop header
LB: loop body
LE: loop exit
PB: predicated region body
PF: predicated region fallthrough
CT: control target
= control target key end

     0   :  { %s2643_s12 = smov 0   ;;  %s2645_s13 = smov 0   ;;  %s3104_s0 = inlined_call_operand.vmem [shape: bf16[2,1,110,16], index: 0, kind: input, shape index: {}]   ;;  %s3105_s1 = inlined_call_operand.vmem [shape: bf16[9,16,32], index: 1, kind: input, shape index: {}]   ;;  %s3106_s2 = inlined_call_operand.vmem [shape: f32[1,32], index: 2, kind: input, shape index: {}]   ;;  %s3107_s3 = inlined_call_operand.vmem [shape: bf16[2,1,80,32], index: 3, kind: output, shape index: {}]  }
   0x1   :  { %s2647_s14 = smov 0  }
   0x2 LB: > { %s25_s15 = sadd.s32 1, %s2615_s13  ;;  %p2104_p0 = scmp.ge.s32.totalorder %s2619_s14, 1  ;;  %s2619_s14 = sphi %s2647_s14, %s13_s14   ;;  %s2615_s13 = sphi %s2645_s13, %s3109_s13   ;;  %s2611_s12 = sphi %s2643_s12, %s3108_s12  }
   0x3   : > { %p27_p1 = scmp.ge.s32.totalorder %s25_s15, 2  ;;  %p157_p2 = scmp.lt.s32.totalorder %s2619_s14, 3 }
   0x5   : > { %s3111_s15 = smov (%p27_p1, %s25_s15), 0  ;;  %p158_p3 = pnand %p2104_p0, %p157_p2 }
   0x6   : > { %v2535_v0 = vld [vmem:[%s3105_s1] sm:$0xff] (!%p158_p3)   ;;  %v2621_v1 = vmov (!%p158_p3), 0.0   ;;  %p189_p4 = scmp.lt.s32.totalorder (!%p158_p3), %s2611_s12, 1  ;;  %vm2622_vm0 = vmmov (!%p158_p3), 0   ;;  %v2538_v2 = vld [vmem:[%s3105_s1 + $0x8] sm:$0xff] (!%p158_p3)   ;;  %vm272_vm1 = vcmask (!%p158_p3), 130048  }
   0x7   : > { %161 = sbr.rel (%p158_p3) target bundleno = 429 (0x1ad), region = 32  ;;  %2505 = vmatprep.subr.bf16.mxu1 (!%p158_p3), %v2621_v1  ;;  %2307 = vmatprep.subr.bf16.mxu0 (!%p158_p3), %v2621_v1  ;;  %v2539_v3 = vld [vmem:[%s3105_s1 + $0x10] sm:$0xff] (!%p158_p3)   ;;  %vm433_vm2 = vsmask.f32 (!%p158_p3), 7424  ;;  %v2545_v21 = vld [vmem:[%s3105_s1 + $0x18] sm:$0xff] (!%p158_p3)   ;;  %vm644_vm3 = vcmask (!%p158_p3), 1046528  }
   0x8   : > { %2506 = vmatpush3.bf16.msra.mxu1 (!%p158_p3), %v2535_v0  ;;  %2308 = vmatpush3.bf16.msra.mxu0 (!%p158_p3), %v2535_v0  ;;  %v2549_v29 = vld [vmem:[%s3105_s1 + $0x20] sm:$0xff] (!%p158_p3)   ;;  %vm999_vm4 = vsmask.f32 (!%p158_p3), 6400  ;;  %vm208_vm5 = vcmask (!%p158_p3), 261120   ;;  %vm1219_vm6 = vcmask (!%p158_p3), 1045504   ;;  %vm1794_vm8 = vcmask (!%p158_p3), 1044480  }
   0x9   : > { %2309 = vmatprep.mubr.msk.bf16.mxu0 (!%p158_p3), %vm2622_vm0, %v2621_v1  ;;  %2321 = vmatprep.mubr.msk.bf16.mxu1 (!%p158_p3), %vm2622_vm0, %v2621_v1  ;;  %209 = vst.msk [vmem:[#allocation2] sm:$0xff] (!%p158_p3), %vm208_vm5, %v2621_v1  ;;  %210 = vst.msk [vmem:[#allocation2 + $0x8] sm:$0xff] (!%p158_p3), %vm208_vm5, %v2621_v1  ;;  %vm1574_vm7 = vsmask.f32 (!%p158_p3), 5376  ;;  %vm1997_vm9 = vcmask (!%p158_p3), 257024  }
   0xa   : > { %2329 = vmatprep.subr.bf16.mxu1 (!%p158_p3), %v2621_v1  ;;  %2351 = vmatprep.subr.bf16.mxu0 (!%p158_p3), %v2621_v1  ;;  %211 = vst.msk [vmem:[#allocation2 + $0x10] sm:$0xff] (!%p158_p3), %vm208_vm5, %v2621_v1  ;;  %212 = vst.msk [vmem:[#allocation2 + $0x18] sm:$0xff] (!%p158_p3), %vm208_vm5, %v2621_v1 }
   0xb   : > { %213 = vst.msk [vmem:[#allocation2 + $0x20] sm:$0xff] (!%p158_p3), %vm208_vm5, %v2621_v1  ;;  %214 = vst.msk [vmem:[#allocation2 + $0x28] sm:$0xff] (!%p158_p3), %vm208_vm5, %v2621_v1 }
   0xc   : > { %215 = vst.msk [vmem:[#allocation2 + $0x30] sm:$0xff] (!%p158_p3), %vm208_vm5, %v2621_v1  ;;  %216 = vst.msk [vmem:[#allocation2 + $0x38] sm:$0xff] (!%p158_p3), %vm208_vm5, %v2621_v1 }
   0xd   : > { %217 = vst.msk [vmem:[#allocation2 + $0x40] sm:$0xff] (!%p158_p3), %vm208_vm5, %v2621_v1  ;;  %218 = vst.msk [vmem:[#allocation2 + $0x48] sm:$0xff] (!%p158_p3), %vm208_vm5, %v2621_v1 }
   0xe   : > { %s3113_s12 = smov (!%p189_p4, %s2611_s12), 1 }
   0xf   : > { %s2507_s18 = smul.u32 56, %s3113_s12 }
  0x10   : > { %s2508_s17 = smul.u32 40, %s3113_s12 }
  0x11   : > { %s2681_s23 = scalar_lea.vmem %s3104_s0, %s2507_s18 }
  0x12   : > { %v2536_v4 = vld [vmem:[%s2681_s23] sm:$0xff]   ;;  %v2537_v5 = vld [vmem:[%s2681_s23 + $0x18] sm:$0xff]   ;;  %v2540_v6 = vld [vmem:[%s2681_s23 + $0x8] sm:$0xff]   ;;  %s3055_s12 = scalar_lea.vmem %s3107_s3, %s2508_s17 }
  0x13   : > { %2310 = vmatmul.mubr.msk.bf16.vlgmr.msra.gmra.mrb[0].mxu0 %vm272_vm1, %v2536_v4  ;;  %2322 = vmatmul.mubr.msk.bf16.vlgmr.msra.gmra.mrb[0].mxu1 %vm272_vm1, %v2537_v5  ;;  %v2543_v7 = vld [vmem:[%s2681_s23] sm:$0xff]   ;;  %v2544_v8 = vld [vmem:[%s2681_s23 + $0x8] sm:$0xff]   ;;  %v2546_v16 = vld [vmem:[%s2681_s23 + $0x10] sm:$0xff]  }
  0x14   : > { %2352 = vmatpush3.bf16.msra.mxu0 %v2539_v3  ;;  %2330 = vmatpush3.bf16.msra.mxu1 %v2538_v2  ;;  %v2541_v9 = vld [vmem:[%s2681_s23 + $0x20] sm:$0xff]   ;;  %v435_v10 = vshrl.u32 %v2543_v7, 16  ;;  %v437_v11 = vshll.u32 %v2543_v7, 16  ;;  %v442_v12 = vshll.u32 %v2544_v8, 16  ;;  %v2542_v17 = vld [vmem:[%s2681_s23 + $0x10] sm:$0xff]   ;;  %v2548_v19 = vld [vmem:[%s2681_s23 + $0x8] sm:$0xff]  }
  0x15   : > { %2313 = vmatprep.mubr.msk.bf16.mxu0 %vm2622_vm0, %v2621_v1  ;;  %2325 = vmatprep.mubr.msk.bf16.mxu1 %vm2622_vm0, %v2621_v1  ;;  %v2547_v18 = vld [vmem:[%s2681_s23] sm:$0xfe]   ;;  %v446_v22 = vshrl.u32 %v2544_v8, 16  ;;  %v450_v23 = vshll.u32 %v2546_v16, 16  ;;  %v646_v25 = vrot.slane %v2548_v19, 1  ;;  %v2550_v28 = vld [vmem:[%s2681_s23 + $0x18] sm:$0xff]  }
  0x16   : > { %2373 = vmatprep.subr.bf16.mxu1 %v2621_v1  ;;  %2395 = vmatprep.subr.bf16.mxu0 %v2621_v1  ;;  %v439_v13 = vrot.slane %v437_v11, 1  ;;  %v444_v15 = vrot.slane %v442_v12, 1  ;;  %v645_v24 = vrot.slane %v2547_v18, 1  ;;  %v2551_v31 = vld [vmem:[%s2681_s23 + $0x10] sm:$0xff]   ;;  %v454_v33 = vshrl.u32 %v2546_v16, 16  ;;  %v2552_v36 = vld [vmem:[%s2681_s23 + $0x20] sm:$0xff]  }
  0x17   : > { %v452_v27 = vrot.slane %v450_v23, 1  ;;  %v458_v34 = vshll.u32 %v2550_v28, 16  ;;  %v648_v35 = vrot.slane %v2551_v31, 1  ;;  %v2737_v39 = vld [vmem:[%s2681_s23 + $0x24] sm:$0xff]   ;;  %v462_v41 = vshrl.u32 %v2550_v28, 16  ;;  %v2553_v43 = vld [vmem:[%s2681_s23 + $0x18] sm:$0xff]  }
  0x18   : > { %v440_v14 = vor.u32 %v439_v13, %v435_v10  ;;  %v448_v26 = vor.u32 %v446_v22, %v444_v15  ;;  %v647_v30 = vsel %vm644_vm3, %v645_v24, %v646_v25  ;;  %v466_v42 = vshll.u32 %v2552_v36, 16  ;;  %v2568_v44 = vld [vmem:[%s2681_s23 + $0x2c] ss:$0 sps:$4 sm:$0x11]   ;;  %v2555_v53 = vld [vmem:[%s2681_s23 + $0x20] sm:$0xff]  }
  0x19   : > { %v456_v37 = vor.u32 %v454_v33, %v452_v27  ;;  %v460_v38 = vrot.slane %v458_v34, 1  ;;  %v649_v40 = vsel %vm644_vm3, %v646_v25, %v648_v35  ;;  %v829_v46 = vrot.slane %v2737_v39, 1  ;;  %v2554_v52 = vld [vmem:[%s2681_s23 + $0x28] ss:$0 sps:$4 sm:$0x11]   ;;  %v2562_v62 = vld [vmem:[%s2681_s23 + $0xc] sm:$0xff]  }
  0x1a   : > { %v445_v20 = vsel %vm433_vm2, %v440_v14, %v444_v15  ;;  %v453_v32 = vsel %vm433_vm2, %v448_v26, %v452_v27  ;;  %v831_v47 = vrot.slane %v2568_v44, 1  ;;  %v650_v48 = vrot.slane %v2553_v43, 1  ;;  %v2556_v61 = vld [vmem:[%s2681_s23 + $0x28] ss:$0 sps:$4 sm:$0x11]   ;;  %v2558_v4 = vld [vmem:[%s2681_s23 + $0xc] sm:$0xff]  }
  0x1b   : > { %2314 = vmatmul.mubr.msk.bf16.gmra.mrb[4].mxu0 %vm272_vm1, %v2540_v6  ;;  %2326 = vmatmul.mubr.msk.bf16.gmra.mrb[4].mxu1 %vm272_vm1, %v2541_v9  ;;  %v461_v45 = vsel %vm433_vm2, %v456_v37, %v460_v38  ;;  %v464_v50 = vor.u32 %v462_v41, %v460_v38  ;;  %v468_v51 = vrot.slane %v466_v42, 1  ;;  %v470_v56 = vshrl.u32 %v2552_v36, 16  ;;  %v2561_v0 = vld [vmem:[%s2681_s23 + $0x4] sm:$0xfe]   ;;  %v2565_v15 = vld [vmem:[%s2681_s23 + $0x14] sm:$0xff]  }
  0x1c   : > { %2317 = vmatprep.mubr.msk.bf16.mxu0 %vm2622_vm0, %v2621_v1  ;;  %2331 = vmatprep.mubr.msk.bf16.mxu1 %vm2622_vm0, %v2621_v1  ;;  %v2751_v49 = vsel %vm644_vm3, %v829_v46, %v831_v47  ;;  %v651_v54 = vsel %vm644_vm3, %v648_v35, %v650_v48  ;;  %v474_v57 = vshll.u32 %v2554_v52, 16  ;;  %v652_v58 = vrot.slane %v2555_v53, 1  ;;  %v2557_v3 = vld [vmem:[%s2681_s23 + $0x4] sm:$0xfe]   ;;  %v2563_v27 = vld [vmem:[%s3105_s1 + $0x30] sm:$0xff]  }
  0x1d   : > { %v469_v55 = vsel %vm433_vm2, %v464_v50, %v468_v51  ;;  %v472_v59 = vor.u32 %v470_v56, %v468_v51  ;;  %v1009_v5 = vshrl.u32 %v2562_v62, 16  ;;  %v1012_v6 = vshll.u32 %v2562_v62, 16  ;;  %v2559_v12 = vld [vmem:[%s3105_s1 + $0x28] sm:$0xff]  }
  0x1e   : > { %v476_v60 = vrot.slane %v474_v57, 1  ;;  %v653_v63 = vsel %vm644_vm3, %v650_v48, %v652_v58  ;;  %v654_v7 = vrot.slane %v2556_v61, 1  ;;  %v1001_v8 = vshrl.u32 %v2561_v0, 16  ;;  %v2569_v41 = vld [vmem:[%s2681_s23 + $0x24] sm:$0xff]  }
  0x1f   : > { %v1004_v9 = vshll.u32 %v2561_v0, 16  ;;  %v822_v10 = vrot.slane %v2557_v3, 1  ;;  %v823_v11 = vrot.slane %v2558_v4, 1  ;;  %v1011_v13 = vrot.slane %v1009_v5, 1  ;;  %v2576_v0 = vld [vmem:[%s2681_s23 + $0x10] sm:$0xff]  }
  0x20   : > { %v477_v2 = vsel %vm433_vm2, %v472_v59, %v476_v60  ;;  %v1014_v14 = vrot.slane %v1012_v6, 2  ;;  %v655_v16 = vsel %vm644_vm3, %v652_v58, %v654_v7  ;;  %v1018_v23 = vshrl.u32 %v2565_v15, 16  ;;  %v2570_v51 = vld [vmem:[%s2681_s23 + $0x2c] ss:$0 sps:$4 sm:$0x33]   ;;  %v2574_v3 = vld [vmem:[%s2681_s23 + $0x14] sm:$0xff]  }
  0x21   : > { %v1006_v18 = vrot.slane %v1004_v9, 2  ;;  %v824_v19 = vsel %vm644_vm3, %v822_v10, %v823_v11  ;;  %v1021_v24 = vshll.u32 %v2565_v15, 16  ;;  %v1036_v44 = vshrl.u32 %v2569_v41, 16  ;;  %v2572_v58 = vld [vmem:[%s2681_s23 + $0xc] sm:$0xff]   ;;  %v2579_v9 = vld [vmem:[%s2681_s23 + $0x18] sm:$0xff]   ;;  %v2581_v15 = vld [vmem:[%s2681_s23 + $0x20] sm:$0xff]  }
  0x22   : > { %v1015_v22 = vor.u32 %v1014_v14, %v1011_v13  ;;  %v1020_v28 = vrot.slane %v1018_v23, 1  ;;  %v1221_v61 = vrot.slane %v2572_v58, 2  ;;  %v1398_v5 = vrot.slane %v2576_v0, 2 }
  0x23   : > { %2318 = vmatmul.mubr.msk.bf16.gmra.mrb[8].mxu0 %vm272_vm1, %v2542_v17  ;;  %2332 = vmatmul.mubr.msk.bf16.vlgmr.msra.gmra.mrb[8].mxu1 %vm272_vm1, %v445_v20  ;;  %v1003_v17 = vrot.slane %v1001_v8, 1  ;;  %v2560_v20 = vld [vmem:[%s2681_s23 + $0x14] sm:$0xff]   ;;  %v1038_v48 = vrot.slane %v1036_v44, 1  ;;  %v1223_v6 = vrot.slane %v2574_v3, 2  ;;  %v2577_v8 = vld [vmem:[%s3105_s1 + $0x40] sm:$0xff]  }
  0x24   : > { %2353 = vmatprep.mubr.msk.bf16.mxu0 %vm2622_vm0, %v2621_v1  ;;  %2374 = vmatpush3.bf16.msra.mxu1 %v2545_v21  ;;  %v825_v25 = vrot.slane %v2560_v20, 1 }
  0x25   : > { %2335 = vmatprep.mubr.msk.bf16.mxu1 %vm2622_vm0, %v2621_v1  ;;  %2417 = vmatprep.subr.bf16.mxu1 %v2621_v1  ;;  %v1007_v21 = vor.u32 %v1006_v18, %v1003_v17  ;;  %v1224_v10 = vsel %vm1219_vm6, %v1221_v61, %v1223_v6  ;;  %v2580_v17 = vld [vmem:[%s2681_s23 + $0x24] sm:$0xff]   ;;  %v1402_v18 = vrot.slane %v2581_v15, 2 }
  0x26   : > { %v826_v31 = vsel %vm644_vm3, %v823_v11, %v825_v25  ;;  %v2578_v11 = vld [vmem:[%s2681_s23 + $0x1c] sm:$0xff]   ;;  %v2595_v15 = vld [vmem:[%s2681_s23 + $0x28] sm:$0xff]  }
  0x27   : > { %v1016_v26 = vsel %vm999_vm4, %v1007_v21, %v1015_v22  ;;  %v1225_v13 = vrot.slane %v2578_v11, 2  ;;  %v2582_v21 = vld [vmem:[%s2681_s23 + $0x2c] ss:$0 sps:$4 sm:$0x33]  }
  0x2b   : > { %2354 = vmatmul.mubr.msk.bf16.vlgmr.msra.gmra.mrb[12].mxu0 %vm272_vm1, %v647_v30  ;;  %2336 = vmatmul.mubr.msk.bf16.gmra.mrb[12].mxu1 %vm272_vm1, %v453_v32  ;;  %v2567_v30 = vld [vmem:[%s2681_s23 + $0x1c] sm:$0xff]  }
  0x2c   : > { %2396 = vmatpush3.bf16.msra.mxu0 %v2549_v29  ;;  %2339 = vmatprep.mubr.msk.bf16.mxu1 %vm2622_vm0, %v2621_v1  ;;  %v1023_v29 = vrot.slane %v1021_v24, 2  ;;  %v2564_v32 = vld [vmem:[%s2681_s23 + $0x1c] sm:$0xff]   ;;  %v1027_v34 = vshrl.u32 %v2567_v30, 16  ;;  %v1030_v35 = vshll.u32 %v2567_v30, 16  ;;  %v2585_v24 = vld [vmem:[%s2681_s23 + $0x8] sm:$0xfc]  }
  0x2d   : > { %2357 = vmatprep.mubr.msk.bf16.mxu0 %vm2622_vm0, %v2621_v1  ;;  %2439 = vmatprep.subr.bf16.mxu0 %v2621_v1  ;;  %v827_v36 = vrot.slane %v2564_v32, 1 }
  0x2e   : > { %v1024_v33 = vor.u32 %v1023_v29, %v1020_v28  ;;  %v1029_v38 = vrot.slane %v1027_v34, 1  ;;  %v1576_v28 = vshrl.u32 %v2585_v24, 16  ;;  %v1579_v29 = vshll.u32 %v2585_v24, 16  ;;  %v2584_v34 = vld [vmem:[%s2681_s23 + $0x30] ss:$0 sps:$4 sm:$0x33]  }
  0x2f   : > { %v828_v42 = vsel %vm644_vm3, %v825_v25, %v827_v36  ;;  %v830_v52 = vsel %vm644_vm3, %v827_v36, %v829_v46  ;;  %v2571_v46 = vld [vmem:[%s2681_s23 + $0x4] sm:$0xfc]   ;;  %v2586_v25 = vld [vmem:[%s2681_s23 + $0x10] sm:$0xff]  }
  0x30   : > { %v1025_v37 = vsel %vm999_vm4, %v1015_v22, %v1024_v33  ;;  %v1220_v60 = vrot.slane %v2571_v46, 2  ;;  %v2583_v22 = vld [vmem:[%s2681_s23 + $0x28] sm:$0xff]   ;;  %v1584_v30 = vshrl.u32 %v2586_v25, 16  ;;  %v1581_v36 = vrot.slane %v1579_v29, 3 }
  0x31   : > { %v230_v29 = vld [vmem:[#allocation2 + $0x8] sm:$0xff] }
  0x33   : > { %2358 = vmatmul.mubr.msk.bf16.gmra.mrb[16].mxu0 %vm272_vm1, %v649_v40  ;;  %2340 = vmatmul.mubr.msk.bf16.gmra.mrb[16].mxu1 %vm272_vm1, %v461_v45  ;;  %v1032_v40 = vrot.slane %v1030_v35, 2  ;;  %v1039_v45 = vshll.u32 %v2569_v41, 16  ;;  %v1578_v35 = vrot.slane %v1576_v28, 2  ;;  %v1406_v41 = vrot.slane %v2584_v34, 2 }
  0x34   : > { %2361 = vmatprep.mubr.msk.bf16.mxu0 %vm2622_vm0, %v2621_v1  ;;  %2343 = vmatprep.mubr.msk.bf16.mxu1 %vm2622_vm0, %v2621_v1 }
  0x35   : > { %v1033_v43 = vor.u32 %v1032_v40, %v1029_v38  ;;  %v1041_v50 = vrot.slane %v1039_v45, 2  ;;  %v2587_v40 = vld [vmem:[%s2681_s23 + $0x18] sm:$0xff]  }
  0x36   : > { %v1593_v44 = vshrl.u32 %v2587_v40, 16  ;;  %v1596_v45 = vshll.u32 %v2587_v40, 16 }
  0x37   : > { %v1034_v47 = vsel %vm999_vm4, %v1024_v33, %v1033_v43  ;;  %v1042_v53 = vor.u32 %v1041_v50, %v1038_v48  ;;  %v2588_v48 = vld [vmem:[%s2681_s23 + $0x8] sm:$0xf8]   ;;  %v2589_v50 = vld [vmem:[%s2681_s23 + $0x10] sm:$0xff]  }
  0x39   : > { %v1043_v56 = vsel %vm999_vm4, %v1033_v43, %v1042_v53 }
  0x3b   : > { %2362 = vmatmul.mubr.msk.bf16.gmra.mrb[20].mxu0 %vm272_vm1, %v651_v54  ;;  %2344 = vmatmul.mubr.msk.bf16.gmra.mrb[20].mxu1 %vm272_vm1, %v469_v55  ;;  %v1045_v54 = vshrl.u32 %v2570_v51, 16  ;;  %v1048_v55 = vshll.u32 %v2570_v51, 16 }
  0x3c   : > { %2365 = vmatprep.mubr.msk.bf16.mxu0 %vm2622_vm0, %v2621_v1  ;;  %2347 = vmatprep.mubr.msk.bf16.mxu1 %vm2622_vm0, %v2621_v1 }
  0x3d   : > { %v1047_v39 = vrot.slane %v1045_v54, 1  ;;  %v1050_v57 = vrot.slane %v1048_v55, 2  ;;  %v2590_v54 = vld [vmem:[%s2681_s23 + $0x20] sm:$0xff]   ;;  %v1795_v55 = vrot.slane %v2588_v48, 3 }
  0x3e   : > { %v1605_v46 = vshll.u32 %v2590_v54, 16 }
  0x3f   : > { %v1051_v59 = vor.u32 %v1050_v57, %v1047_v39  ;;  %v1602_v57 = vshrl.u32 %v2590_v54, 16 }
  0x41   : > { %v1052_v62 = vsel %vm999_vm4, %v1042_v53, %v1051_v59  ;;  %v1598_v53 = vrot.slane %v1596_v45, 3  ;;  %v2591_v59 = vld [vmem:[%s2681_s23 + $0x18] sm:$0xff]  }
  0x42   : > { %v1798_v0 = vrot.slane %v2591_v59, 3  ;;  %v232_v45 = vld [vmem:[#allocation2 + $0x18] sm:$0xff] }
  0x43   : > { %2366 = vmatmul.mubr.msk.bf16.gmra.mrb[24].mxu0 %vm272_vm1, %v653_v63  ;;  %2348 = vmatmul.mubr.msk.bf16.gmra.mrb[24].mxu1 %vm272_vm1, %v477_v2  ;;  %v2575_v63 = vld [vmem:[%s2681_s23 + $0x8] sm:$0xfc]   ;;  %v1222_v2 = vsel %vm1219_vm6, %v1220_v60, %v1221_v61  ;;  %v1604_v61 = vrot.slane %v1602_v57, 2 }
  0x44   : > { %2369 = vmatprep.mubr.msk.bf16.mxu0 %vm2622_vm0, %v2621_v1  ;;  %2375 = vmatprep.mubr.msk.bf16.mxu1 %vm2622_vm0, %v2621_v1  ;;  %v1397_v4 = vrot.slane %v2575_v63, 2  ;;  %v2592_v63 = vld [vmem:[%s2681_s23 + $0x28] sm:$0xff]  }
  0x45   : > { %v1614_v3 = vshll.u32 %v2592_v63, 16 }
  0x46   : > { %v1399_v7 = vsel %vm1219_vm6, %v1397_v4, %v1398_v5 }
  0x4b   : > { %2370 = vmatmul.mubr.msk.bf16.gmra.mrb[28].mxu0 %vm272_vm1, %v655_v16  ;;  %2376 = vmatmul.mubr.msk.bf16.vlgmr.msra.gmra.mrb[28].mxu1 %vm272_vm1, %v824_v19  ;;  %v1226_v16 = vsel %vm1219_vm6, %v1223_v6, %v1225_v13  ;;  %v1227_v19 = vrot.slane %v2580_v17, 2 }
  0x4c   : > { %2397 = vmatprep.mubr.msk.bf16.mxu0 %vm2622_vm0, %v2621_v1  ;;  %2418 = vmatpush3.bf16.msra.mxu1 %v2559_v12  ;;  %v1400_v12 = vrot.slane %v2579_v9, 2  ;;  %v2594_v9 = vld [vmem:[%s2681_s23 + $0x30] ss:$0 sps:$4 sm:$0x77]  }
  0x4d   : > { %2379 = vmatprep.mubr.msk.bf16.mxu1 %vm2622_vm0, %v2621_v1  ;;  %2461 = vmatprep.subr.bf16.mxu1 %v2621_v1  ;;  %v1228_v23 = vsel %vm1219_vm6, %v1225_v13, %v1227_v19  ;;  %v1623_v13 = vshll.u32 %v2594_v9, 16 }
  0x4e   : > { %v1401_v14 = vsel %vm1219_vm6, %v1398_v5, %v1400_v12  ;;  %v1403_v20 = vsel %vm1219_vm6, %v1400_v12, %v1402_v18  ;;  %v2593_v5 = vld [vmem:[%s2681_s23 + $0x20] sm:$0xff]   ;;  %v1620_v12 = vshrl.u32 %v2594_v9, 16 }
  0x50   : > { %v1622_v17 = vrot.slane %v1620_v12, 2 }
  0x53   : > { %2398 = vmatmul.mubr.msk.bf16.vlgmr.msra.gmra.mrb[32].mxu0 %vm272_vm1, %v1016_v26  ;;  %2380 = vmatmul.mubr.msk.bf16.gmra.mrb[32].mxu1 %vm272_vm1, %v826_v31  ;;  %v1229_v26 = vrot.slane %v2582_v21, 2  ;;  %v1587_v31 = vshll.u32 %v2586_v25, 16 }
  0x54   : > { %2440 = vmatpush3.bf16.msra.mxu0 %v2563_v27  ;;  %2383 = vmatprep.mubr.msk.bf16.mxu1 %vm2622_vm0, %v2621_v1  ;;  %v1404_v27 = vrot.slane %v2583_v22, 2  ;;  %v2596_v22 = vld [vmem:[%s2681_s23 + $0x30] ss:$0 sps:$4 sm:$0x77]  }
  0x55   : > { %2401 = vmatprep.mubr.msk.bf16.mxu0 %vm2622_vm0, %v2621_v1  ;;  %2483 = vmatprep.subr.bf16.mxu0 %v2621_v1  ;;  %v1230_v32 = vsel %vm1219_vm6, %v1227_v19, %v1229_v26  ;;  %v1589_v38 = vrot.slane %v1587_v31, 3  ;;  %v1802_v19 = vrot.slane %v2595_v15, 3  ;;  %v1804_v24 = vrot.slane %v2596_v22, 3  ;;  %v229_v26 = vld [vmem:[#allocation2] sm:$0xff] }
  0x56   : > { %v1405_v33 = vsel %vm1219_vm6, %v1402_v18, %v1404_v27  ;;  %v1625_v18 = vrot.slane %v1623_v13, 3 }
  0x57   : > { %v1805_v25 = vsel %vm1794_vm8, %v1802_v19, %v1804_v24 }
  0x5b   : > { %2402 = vmatmul.mubr.msk.bf16.gmra.mrb[36].mxu0 %vm272_vm1, %v1025_v37  ;;  %2384 = vmatmul.mubr.msk.bf16.gmra.mrb[36].mxu1 %vm272_vm1, %v828_v42  ;;  %v1586_v37 = vrot.slane %v1584_v30, 2  ;;  %v1582_v42 = vor.u32 %v1581_v36, %v1578_v35 }
  0x5c   : > { %2405 = vmatprep.mubr.msk.bf16.mxu0 %vm2622_vm0, %v2621_v1  ;;  %2387 = vmatprep.mubr.msk.bf16.mxu1 %vm2622_vm0, %v2621_v1 }
  0x5d   : > { %v1590_v43 = vor.u32 %v1589_v38, %v1586_v37 }
  0x5f   : > { %v1591_v51 = vsel %vm1574_vm7, %v1582_v42, %v1590_v43  ;;  %v231_v42 = vld [vmem:[#allocation2 + $0x10] sm:$0xff] }
  0x63   : > { %2406 = vmatmul.mubr.msk.bf16.gmra.mrb[40].mxu0 %vm272_vm1, %v1034_v47  ;;  %2388 = vmatmul.mubr.msk.bf16.gmra.mrb[40].mxu1 %vm272_vm1, %v830_v52  ;;  %v1407_v47 = vsel %vm1219_vm6, %v1404_v27, %v1406_v41  ;;  %v1595_v52 = vrot.slane %v1593_v44, 2  ;;  %v235_v27 = vld [vmem:[#allocation2 + $0x30] sm:$0xff] }
  0x64   : > { %2409 = vmatprep.mubr.msk.bf16.mxu0 %vm2622_vm0, %v2621_v1  ;;  %2391 = vmatprep.mubr.msk.bf16.mxu1 %vm2622_vm0, %v2621_v1 }
  0x65   : > { %v1599_v39 = vor.u32 %v1598_v53, %v1595_v52 }
  0x67   : > { %v1600_v60 = vsel %vm1574_vm7, %v1590_v43, %v1599_v39  ;;  %v237_v43 = vld [vmem:[#allocation2 + $0x40] sm:$0xff] }
  0x6b   : > { %2410 = vmatmul.mubr.msk.bf16.gmra.mrb[44].mxu0 %vm272_vm1, %v1043_v56  ;;  %2392 = vmatmul.mubr.msk.bf16.gmra.mrb[44].mxu1 %vm272_vm1, %v2751_v49  ;;  %v2573_v49 = vld [vmem:[%s3105_s1 + $0x38] sm:$0xff]   ;;  %v1796_v56 = vrot.slane %v2589_v50, 3 }
  0x6c   : > { %2413 = vmatprep.mubr.msk.bf16.mxu0 %vm2622_vm0, %v2621_v1  ;;  %2419 = vmatprep.mubr.msk.bf16.mxu1 %vm2622_vm0, %v2621_v1 }
  0x6d   : > { %v1797_v58 = vsel %vm1794_vm8, %v1795_v55, %v1796_v56  ;;  %v1799_v4 = vsel %vm1794_vm8, %v1796_v56, %v1798_v0 }
  0x73   : > { %2414 = vmatmul.mubr.msk.bf16.gmra.mrb[48].mxu0 %vm272_vm1, %v1052_v62  ;;  %2420 = vmatmul.mubr.msk.bf16.vlgmr.msra.gmra.mrb[48].mxu1 %vm272_vm1, %v1222_v2  ;;  %v1607_v62 = vrot.slane %v1605_v46, 3 }
  0x74   : > { %2441 = vmatprep.mubr.msk.bf16.mxu0 %vm2622_vm0, %v2621_v1  ;;  %2462 = vmatpush3.bf16.msra.mxu1 %v2573_v49  ;;  %v1611_v49 = vshrl.u32 %v2592_v63, 16 }
  0x75   : > { %2423 = vmatprep.mubr.msk.bf16.mxu1 %vm2622_vm0, %v2621_v1  ;;  %v1608_v2 = vor.u32 %v1607_v62, %v1604_v61 }
  0x77   : > { %v1609_v6 = vsel %vm1574_vm7, %v1599_v39, %v1608_v2 }
  0x7b   : > { %2442 = vmatmul.mubr.msk.bf16.vlgmr.msra.gmra.mrb[52].mxu0 %vm272_vm1, %v1399_v7  ;;  %2424 = vmatmul.mubr.msk.bf16.gmra.mrb[52].mxu1 %vm272_vm1, %v1224_v10  ;;  %v1613_v7 = vrot.slane %v1611_v49, 2  ;;  %v1800_v10 = vrot.slane %v2593_v5, 3 }
  0x7c   : > { %2484 = vmatpush3.bf16.msra.mxu0 %v2577_v8  ;;  %2427 = vmatprep.mubr.msk.bf16.mxu1 %vm2622_vm0, %v2621_v1  ;;  %v1616_v8 = vrot.slane %v1614_v3, 3 }
  0x7d   : > { %2445 = vmatprep.mubr.msk.bf16.mxu0 %vm2622_vm0, %v2621_v1  ;;  %v1803_v21 = vsel %vm1794_vm8, %v1800_v10, %v1802_v19 }
  0x7e   : > { %v1617_v11 = vor.u32 %v1616_v8, %v1613_v7 }
  0x83   : > { %2446 = vmatmul.mubr.msk.bf16.gmra.mrb[56].mxu0 %vm272_vm1, %v1401_v14  ;;  %2428 = vmatmul.mubr.msk.bf16.gmra.mrb[56].mxu1 %vm272_vm1, %v1226_v16  ;;  %v1801_v14 = vsel %vm1794_vm8, %v1798_v0, %v1800_v10  ;;  %v1618_v16 = vsel %vm1574_vm7, %v1608_v2, %v1617_v11 }
  0x84   : > { %2449 = vmatprep.mubr.msk.bf16.mxu0 %vm2622_vm0, %v2621_v1  ;;  %2431 = vmatprep.mubr.msk.bf16.mxu1 %vm2622_vm0, %v2621_v1 }
  0x8b   : > { %2450 = vmatmul.mubr.msk.bf16.gmra.mrb[60].mxu0 %vm272_vm1, %v1403_v20  ;;  %2432 = vmatmul.mubr.msk.bf16.gmra.mrb[60].mxu1 %vm272_vm1, %v1228_v23  ;;  %v1626_v20 = vor.u32 %v1625_v18, %v1622_v17 }
  0x8c   : > { %2453 = vmatprep.mubr.msk.bf16.mxu0 %vm2622_vm0, %v2621_v1  ;;  %2435 = vmatprep.mubr.msk.bf16.mxu1 %vm2622_vm0, %v2621_v1 }
  0x8d   : > { %v1627_v23 = vsel %vm1574_vm7, %v1617_v11, %v1626_v20 }
  0x93   : > { %2454 = vmatmul.mubr.msk.bf16.gmra.mrb[64].mxu0 %vm272_vm1, %v1405_v33  ;;  %2436 = vmatmul.mubr.msk.bf16.gmra.mrb[64].mxu1 %vm272_vm1, %v1230_v32  ;;  %v236_v33 = vld [vmem:[#allocation2 + $0x38] sm:$0xff] }
  0x94   : > { %2457 = vmatprep.mubr.msk.bf16.mxu0 %vm2622_vm0, %v2621_v1  ;;  %2463 = vmatprep.mubr.msk.bf16.mxu1 %vm2622_vm0, %v2621_v1 }
  0x9b   : > { %2458 = vmatmul.mubr.msk.bf16.gmra.mrb[68].mxu0 %vm272_vm1, %v1407_v47  ;;  %2464 = vmatmul.mubr.msk.bf16.vlgmr.msra.gmra.mrb[68].mxu1 %vm272_vm1, %v1591_v51  ;;  %v238_v51 = vld [vmem:[#allocation2 + $0x48] sm:$0xff] }
  0x9c   : > { %2485 = vmatprep.mubr.msk.bf16.mxu0 %vm2622_vm0, %v2621_v1  ;;  %2467 = vmatprep.mubr.msk.bf16.mxu1 %vm2622_vm0, %v2621_v1 }
  0xa3   : > { %2486 = vmatmul.mubr.msk.bf16.vlgmr.msra.gmra.mrb[72].mxu0 %vm272_vm1, %v1797_v58  ;;  %2468 = vmatmul.mubr.msk.bf16.gmra.mrb[72].mxu1 %vm272_vm1, %v1600_v60  ;;  %v233_v58 = vld [vmem:[#allocation2 + $0x20] sm:$0xff]  ;;  %v234_v60 = vld [vmem:[#allocation2 + $0x28] sm:$0xff] }
  0xa4   : > { %2489 = vmatprep.mubr.msk.bf16.mxu0 %vm2622_vm0, %v2621_v1  ;;  %2471 = vmatprep.mubr.msk.bf16.mxu1 %vm2622_vm0, %v2621_v1 }
  0xab   : > { %2490 = vmatmul.mubr.msk.bf16.gmra.mrb[76].mxu0 %vm272_vm1, %v1799_v4  ;;  %2472 = vmatmul.mubr.msk.bf16.gmra.mrb[76].mxu1 %vm272_vm1, %v1609_v6 }
  0xac   : > { %2493 = vmatprep.mubr.msk.bf16.mxu0 %vm2622_vm0, %v2621_v1  ;;  %2475 = vmatprep.mubr.msk.bf16.mxu1 %vm2622_vm0, %v2621_v1 }
  0xb3   : > { %2494 = vmatmul.mubr.msk.bf16.gmra.mrb[80].mxu0 %vm272_vm1, %v1801_v14  ;;  %2476 = vmatmul.mubr.msk.bf16.gmra.mrb[80].mxu1 %vm272_vm1, %v1618_v16 }
  0xb4   : > { %2497 = vmatprep.mubr.msk.bf16.mxu0 %vm2622_vm0, %v2621_v1  ;;  %2479 = vmatprep.mubr.msk.bf16.mxu1 %vm2622_vm0, %v2621_v1 }
  0xbb   : > { %2498 = vmatmul.mubr.msk.bf16.gmra.mrb[84].mxu0 %vm272_vm1, %v1803_v21  ;;  %2480 = vmatmul.mubr.msk.bf16.gmra.mrb[84].mxu1 %vm272_vm1, %v1627_v23 }
  0xbc   : > { %2501 = vmatprep.mubr.msk.bf16.mxu0 %vm2622_vm0, %v2621_v1 }
  0xc3   : > { %2502 = vmatmul.mubr.msk.bf16.gmra.mrb[88].mxu0 %vm272_vm1, %v1805_v25 }
  0xe6   : > { %v322_v28 = vpop.f32.mrb[0].mxu0  ;;  %v346_v31 = vpop.f32.mrb[0].mxu1 }
  0xe7   : > { %v361_v30 = vadd.f32 %v322_v28, %v229_v26  ;;  %v2311_v32 = vpop.f32.mrb[1].mxu0  ;;  %v367_v34 = vadd.f32 %v346_v31, %v235_v27  ;;  %v2323_v35 = vpop.f32.mrb[1].mxu1 }
  0xe8   : > { %v325_v36 = vpop.f32.mrb[2].mxu0  ;;  %v349_v1 = vpop.f32.mrb[2].mxu1 }
  0xe9   : > { %371 = vst.msk [vmem:[#allocation2] sm:$0xff] %vm208_vm5, %v361_v30  ;;  %v362_v37 = vadd.f32 %v325_v36, %v230_v29  ;;  %v2312_v38 = vpop.f32.mrb[3].mxu0  ;;  %377 = vst.msk [vmem:[#allocation2 + $0x30] sm:$0xff] %vm208_vm5, %v367_v34  ;;  %v368_v40 = vadd.f32 %v349_v1, %v236_v33  ;;  %v2324_v41 = vpop.f32.mrb[3].mxu1 }
  0xeb   : > { %372 = vst.msk [vmem:[#allocation2 + $0x8] sm:$0xff] %vm208_vm5, %v362_v37  ;;  %378 = vst.msk [vmem:[#allocation2 + $0x38] sm:$0xff] %vm208_vm5, %v368_v40 }
  0xee   : > { %v330_v44 = vpop.f32.mrb[4].mxu0  ;;  %v354_v48 = vpop.f32.mrb[4].mxu1 }
  0xef   : > { %v363_v47 = vadd.f32 %v330_v44, %v231_v42  ;;  %v2315_v50 = vpop.f32.mrb[5].mxu0  ;;  %v369_v52 = vadd.f32 %v354_v48, %v237_v43  ;;  %v2327_v53 = vpop.f32.mrb[5].mxu1 }
  0xf0   : > { %v333_v54 = vpop.f32.mrb[6].mxu0  ;;  %v357_v56 = vpop.f32.mrb[6].mxu1  ;;  %v392_v62 = vld [vmem:[#allocation2] sm:$0xff]  ;;  %v398_v43 = vld [vmem:[#allocation2 + $0x30] sm:$0xff] }
  0xf1   : > { %373 = vst.msk [vmem:[#allocation2 + $0x10] sm:$0xff] %vm208_vm5, %v363_v47  ;;  %v364_v55 = vadd.f32 %v333_v54, %v232_v45  ;;  %v2316_v39 = vpop.f32.mrb[7].mxu0  ;;  %379 = vst.msk [vmem:[#allocation2 + $0x40] sm:$0xff] %vm208_vm5, %v369_v52  ;;  %v370_v57 = vadd.f32 %v357_v56, %v238_v51  ;;  %v2328_v46 = vpop.f32.mrb[7].mxu1 }
  0xf2   : > { %v393_v5 = vld [vmem:[#allocation2 + $0x8] sm:$0xff]  ;;  %v399_v52 = vld [vmem:[#allocation2 + $0x38] sm:$0xff] }
  0xf3   : > { %374 = vst.msk [vmem:[#allocation2 + $0x18] sm:$0xff] %vm208_vm5, %v364_v55  ;;  %380 = vst.msk [vmem:[#allocation2 + $0x48] sm:$0xff] %vm208_vm5, %v370_v57 }
  0xf6   : > { %v338_v59 = vpop.f32.mrb[8].mxu0  ;;  %v533_v63 = vpop.f32.mrb[8].mxu1 }
  0xf7   : > { %v365_v61 = vadd.f32 %v338_v59, %v233_v58  ;;  %v2319_v0 = vpop.f32.mrb[9].mxu0  ;;  %v572_v2 = vadd.f32 %v533_v63, %v392_v62  ;;  %v2333_v49 = vpop.f32.mrb[9].mxu1 }
  0xf8   : > { %v341_v3 = vpop.f32.mrb[10].mxu0  ;;  %v536_v6 = vpop.f32.mrb[10].mxu1  ;;  %v394_v11 = vld [vmem:[#allocation2 + $0x10] sm:$0xff]  ;;  %v400_v59 = vld [vmem:[#allocation2 + $0x40] sm:$0xff] }
  0xf9   : > { %375 = vst.msk [vmem:[#allocation2 + $0x20] sm:$0xff] %vm208_vm5, %v365_v61  ;;  %v366_v4 = vadd.f32 %v341_v3, %v234_v60  ;;  %v2320_v7 = vpop.f32.mrb[11].mxu0  ;;  %582 = vst.msk [vmem:[#allocation2] sm:$0xff] %vm208_vm5, %v572_v2  ;;  %v573_v8 = vadd.f32 %v536_v6, %v393_v5  ;;  %v2334_v9 = vpop.f32.mrb[11].mxu1 }
  0xfa   : > { %v395_v18 = vld [vmem:[#allocation2 + $0x18] sm:$0xff]  ;;  %v401_v49 = vld [vmem:[#allocation2 + $0x48] sm:$0xff] }
  0xfb   : > { %376 = vst.msk [vmem:[#allocation2 + $0x28] sm:$0xff] %vm208_vm5, %v366_v4  ;;  %583 = vst.msk [vmem:[#allocation2 + $0x8] sm:$0xff] %vm208_vm5, %v573_v8 }
  0xfe   : > { %v711_v10 = vpop.f32.mrb[12].mxu0  ;;  %v541_v12 = vpop.f32.mrb[12].mxu1 }
  0xff   : > { %v2355_v13 = vpop.f32.mrb[13].mxu0  ;;  %v574_v14 = vadd.f32 %v541_v12, %v394_v11  ;;  %v2337_v15 = vpop.f32.mrb[13].mxu1 }
 0x100   : > { %v714_v16 = vpop.f32.mrb[14].mxu0  ;;  %v603_v17 = vld [vmem:[#allocation2] sm:$0xff]  ;;  %v544_v19 = vpop.f32.mrb[14].mxu1 }
 0x101   : > { %v2356_v20 = vpop.f32.mrb[15].mxu0  ;;  %584 = vst.msk [vmem:[#allocation2 + $0x10] sm:$0xff] %vm208_vm5, %v574_v14  ;;  %v750_v21 = vadd.f32 %v711_v10, %v603_v17  ;;  %v575_v22 = vadd.f32 %v544_v19, %v395_v18  ;;  %v2338_v23 = vpop.f32.mrb[15].mxu1  ;;  %v396_v27 = vld [vmem:[#allocation2 + $0x20] sm:$0xff] }
 0x102   : > { %v604_v24 = vld [vmem:[#allocation2 + $0x8] sm:$0xff] }
 0x103   : > { %760 = vst.msk [vmem:[#allocation2] sm:$0xff] %vm208_vm5, %v750_v21  ;;  %585 = vst.msk [vmem:[#allocation2 + $0x18] sm:$0xff] %vm208_vm5, %v575_v22  ;;  %v751_v25 = vadd.f32 %v714_v16, %v604_v24  ;;  %v397_v34 = vld [vmem:[#allocation2 + $0x28] sm:$0xff] }
 0x105   : > { %761 = vst.msk [vmem:[#allocation2 + $0x8] sm:$0xff] %vm208_vm5, %v751_v25 }
 0x106   : > { %v719_v26 = vpop.f32.mrb[16].mxu0  ;;  %v549_v28 = vpop.f32.mrb[16].mxu1 }
 0x107   : > { %v2359_v29 = vpop.f32.mrb[17].mxu0  ;;  %v576_v30 = vadd.f32 %v549_v28, %v396_v27  ;;  %v2341_v31 = vpop.f32.mrb[17].mxu1 }
 0x108   : > { %v722_v32 = vpop.f32.mrb[18].mxu0  ;;  %v605_v33 = vld [vmem:[#allocation2 + $0x10] sm:$0xff]  ;;  %v552_v35 = vpop.f32.mrb[18].mxu1 }
 0x109   : > { %v2360_v36 = vpop.f32.mrb[19].mxu0  ;;  %586 = vst.msk [vmem:[#allocation2 + $0x20] sm:$0xff] %vm208_vm5, %v576_v30  ;;  %v752_v37 = vadd.f32 %v719_v26, %v605_v33  ;;  %v577_v1 = vadd.f32 %v552_v35, %v397_v34  ;;  %v2342_v38 = vpop.f32.mrb[19].mxu1 }
 0x10a   : > { %v606_v40 = vld [vmem:[#allocation2 + $0x18] sm:$0xff]  ;;  %v781_v11 = vld [vmem:[#allocation2] sm:$0xff] }
 0x10b   : > { %762 = vst.msk [vmem:[#allocation2 + $0x10] sm:$0xff] %vm208_vm5, %v752_v37  ;;  %587 = vst.msk [vmem:[#allocation2 + $0x28] sm:$0xff] %vm208_vm5, %v577_v1  ;;  %v753_v41 = vadd.f32 %v722_v32, %v606_v40 }
 0x10c   : > { %v782_v18 = vld [vmem:[#allocation2 + $0x8] sm:$0xff] }
 0x10d   : > { %763 = vst.msk [vmem:[#allocation2 + $0x18] sm:$0xff] %vm208_vm5, %v753_v41 }
 0x10e   : > { %v727_v42 = vpop.f32.mrb[20].mxu0  ;;  %v557_v44 = vpop.f32.mrb[20].mxu1 }
 0x10f   : > { %v2363_v45 = vpop.f32.mrb[21].mxu0  ;;  %v578_v47 = vadd.f32 %v557_v44, %v398_v43  ;;  %v2345_v48 = vpop.f32.mrb[21].mxu1 }
 0x110   : > { %v730_v50 = vpop.f32.mrb[22].mxu0  ;;  %v607_v51 = vld [vmem:[#allocation2 + $0x20] sm:$0xff]  ;;  %v560_v53 = vpop.f32.mrb[22].mxu1 }
 0x111   : > { %v2364_v54 = vpop.f32.mrb[23].mxu0  ;;  %588 = vst.msk [vmem:[#allocation2 + $0x30] sm:$0xff] %vm208_vm5, %v578_v47  ;;  %v754_v55 = vadd.f32 %v727_v42, %v607_v51  ;;  %v579_v56 = vadd.f32 %v560_v53, %v399_v52  ;;  %v2346_v39 = vpop.f32.mrb[23].mxu1 }
 0x112   : > { %v608_v57 = vld [vmem:[#allocation2 + $0x28] sm:$0xff]  ;;  %v783_v27 = vld [vmem:[#allocation2 + $0x10] sm:$0xff] }
 0x113   : > { %764 = vst.msk [vmem:[#allocation2 + $0x20] sm:$0xff] %vm208_vm5, %v754_v55  ;;  %589 = vst.msk [vmem:[#allocation2 + $0x38] sm:$0xff] %vm208_vm5, %v579_v56  ;;  %v755_v46 = vadd.f32 %v730_v50, %v608_v57 }
 0x114   : > { %v784_v34 = vld [vmem:[#allocation2 + $0x18] sm:$0xff] }
 0x115   : > { %765 = vst.msk [vmem:[#allocation2 + $0x28] sm:$0xff] %vm208_vm5, %v755_v46 }
 0x116   : > { %v735_v58 = vpop.f32.mrb[24].mxu0  ;;  %v565_v60 = vpop.f32.mrb[24].mxu1 }
 0x117   : > { %v2367_v61 = vpop.f32.mrb[25].mxu0  ;;  %v580_v62 = vadd.f32 %v565_v60, %v400_v59  ;;  %v2349_v63 = vpop.f32.mrb[25].mxu1 }
 0x118   : > { %v738_v0 = vpop.f32.mrb[26].mxu0  ;;  %v609_v2 = vld [vmem:[#allocation2 + $0x30] sm:$0xff]  ;;  %v568_v3 = vpop.f32.mrb[26].mxu1 }
 0x119   : > { %v2368_v4 = vpop.f32.mrb[27].mxu0  ;;  %590 = vst.msk [vmem:[#allocation2 + $0x40] sm:$0xff] %vm208_vm5, %v580_v62  ;;  %v756_v5 = vadd.f32 %v735_v58, %v609_v2  ;;  %v581_v6 = vadd.f32 %v568_v3, %v401_v49  ;;  %v2350_v7 = vpop.f32.mrb[27].mxu1 }
 0x11a   : > { %v610_v8 = vld [vmem:[#allocation2 + $0x38] sm:$0xff]  ;;  %v785_v43 = vld [vmem:[#allocation2 + $0x20] sm:$0xff] }
 0x11b   : > { %766 = vst.msk [vmem:[#allocation2 + $0x30] sm:$0xff] %vm208_vm5, %v756_v5  ;;  %591 = vst.msk [vmem:[#allocation2 + $0x48] sm:$0xff] %vm208_vm5, %v581_v6  ;;  %v757_v9 = vadd.f32 %v738_v0, %v610_v8 }
 0x11c   : > { %v786_v52 = vld [vmem:[#allocation2 + $0x28] sm:$0xff] }
 0x11d   : > { %767 = vst.msk [vmem:[#allocation2 + $0x38] sm:$0xff] %vm208_vm5, %v757_v9 }
 0x11e   : > { %v743_v10 = vpop.f32.mrb[28].mxu0  ;;  %v888_v12 = vpop.f32.mrb[28].mxu1 }
 0x11f   : > { %v2371_v13 = vpop.f32.mrb[29].mxu0  ;;  %v927_v14 = vadd.f32 %v888_v12, %v781_v11  ;;  %v2377_v15 = vpop.f32.mrb[29].mxu1 }
 0x120   : > { %v746_v16 = vpop.f32.mrb[30].mxu0  ;;  %v611_v17 = vld [vmem:[#allocation2 + $0x40] sm:$0xff]  ;;  %v891_v19 = vpop.f32.mrb[30].mxu1 }
 0x121   : > { %v2372_v20 = vpop.f32.mrb[31].mxu0  ;;  %v758_v21 = vadd.f32 %v743_v10, %v611_v17  ;;  %937 = vst.msk [vmem:[#allocation2] sm:$0xff] %vm208_vm5, %v927_v14  ;;  %v928_v22 = vadd.f32 %v891_v19, %v782_v18  ;;  %v2378_v23 = vpop.f32.mrb[31].mxu1 }
 0x122   : > { %v612_v24 = vld [vmem:[#allocation2 + $0x48] sm:$0xff]  ;;  %v787_v59 = vld [vmem:[#allocation2 + $0x30] sm:$0xff] }
 0x123   : > { %768 = vst.msk [vmem:[#allocation2 + $0x40] sm:$0xff] %vm208_vm5, %v758_v21  ;;  %v759_v25 = vadd.f32 %v746_v16, %v612_v24  ;;  %938 = vst.msk [vmem:[#allocation2 + $0x8] sm:$0xff] %vm208_vm5, %v928_v22 }
 0x124   : > { %v788_v49 = vld [vmem:[#allocation2 + $0x38] sm:$0xff] }
 0x125   : > { %769 = vst.msk [vmem:[#allocation2 + $0x48] sm:$0xff] %vm208_vm5, %v759_v25 }
 0x126   : > { %v1108_v26 = vpop.f32.mrb[32].mxu0  ;;  %v896_v28 = vpop.f32.mrb[32].mxu1 }
 0x127   : > { %v2399_v29 = vpop.f32.mrb[33].mxu0  ;;  %v929_v30 = vadd.f32 %v896_v28, %v783_v27  ;;  %v2381_v31 = vpop.f32.mrb[33].mxu1 }
 0x128   : > { %v1111_v32 = vpop.f32.mrb[34].mxu0  ;;  %v958_v33 = vld [vmem:[#allocation2] sm:$0xff]  ;;  %v899_v35 = vpop.f32.mrb[34].mxu1 }
 0x129   : > { %v2400_v36 = vpop.f32.mrb[35].mxu0  ;;  %939 = vst.msk [vmem:[#allocation2 + $0x10] sm:$0xff] %vm208_vm5, %v929_v30  ;;  %v1147_v37 = vadd.f32 %v1108_v26, %v958_v33  ;;  %v930_v1 = vadd.f32 %v899_v35, %v784_v34  ;;  %v2382_v38 = vpop.f32.mrb[35].mxu1 }
 0x12a   : > { %v959_v40 = vld [vmem:[#allocation2 + $0x8] sm:$0xff]  ;;  %v789_v11 = vld [vmem:[#allocation2 + $0x40] sm:$0xff] }
 0x12b   : > { %1157 = vst.msk [vmem:[#allocation2] sm:$0xff] %vm208_vm5, %v1147_v37  ;;  %940 = vst.msk [vmem:[#allocation2 + $0x18] sm:$0xff] %vm208_vm5, %v930_v1  ;;  %v1148_v41 = vadd.f32 %v1111_v32, %v959_v40 }
 0x12c   : > { %v790_v18 = vld [vmem:[#allocation2 + $0x48] sm:$0xff] }
 0x12d   : > { %1158 = vst.msk [vmem:[#allocation2 + $0x8] sm:$0xff] %vm208_vm5, %v1148_v41 }
 0x12e   : > { %v1116_v42 = vpop.f32.mrb[36].mxu0  ;;  %v904_v44 = vpop.f32.mrb[36].mxu1 }
 0x12f   : > { %v2403_v45 = vpop.f32.mrb[37].mxu0  ;;  %v931_v47 = vadd.f32 %v904_v44, %v785_v43  ;;  %v2385_v48 = vpop.f32.mrb[37].mxu1 }
 0x130   : > { %v1119_v50 = vpop.f32.mrb[38].mxu0  ;;  %v960_v51 = vld [vmem:[#allocation2 + $0x10] sm:$0xff]  ;;  %v907_v53 = vpop.f32.mrb[38].mxu1 }
 0x131   : > { %v2404_v54 = vpop.f32.mrb[39].mxu0  ;;  %941 = vst.msk [vmem:[#allocation2 + $0x20] sm:$0xff] %vm208_vm5, %v931_v47  ;;  %v1149_v55 = vadd.f32 %v1116_v42, %v960_v51  ;;  %v932_v56 = vadd.f32 %v907_v53, %v786_v52  ;;  %v2386_v39 = vpop.f32.mrb[39].mxu1 }
 0x132   : > { %v961_v57 = vld [vmem:[#allocation2 + $0x18] sm:$0xff]  ;;  %v1178_v27 = vld [vmem:[#allocation2] sm:$0xff] }
 0x133   : > { %1159 = vst.msk [vmem:[#allocation2 + $0x10] sm:$0xff] %vm208_vm5, %v1149_v55  ;;  %942 = vst.msk [vmem:[#allocation2 + $0x28] sm:$0xff] %vm208_vm5, %v932_v56  ;;  %v1150_v46 = vadd.f32 %v1119_v50, %v961_v57 }
 0x134   : > { %v1179_v34 = vld [vmem:[#allocation2 + $0x8] sm:$0xff] }
 0x135   : > { %1160 = vst.msk [vmem:[#allocation2 + $0x18] sm:$0xff] %vm208_vm5, %v1150_v46 }
 0x136   : > { %v1124_v58 = vpop.f32.mrb[40].mxu0  ;;  %v912_v60 = vpop.f32.mrb[40].mxu1 }
 0x137   : > { %v2407_v61 = vpop.f32.mrb[41].mxu0  ;;  %v933_v62 = vadd.f32 %v912_v60, %v787_v59  ;;  %v2389_v63 = vpop.f32.mrb[41].mxu1 }
 0x138   : > { %v1127_v0 = vpop.f32.mrb[42].mxu0  ;;  %v962_v2 = vld [vmem:[#allocation2 + $0x20] sm:$0xff]  ;;  %v915_v3 = vpop.f32.mrb[42].mxu1 }
 0x139   : > { %v2408_v4 = vpop.f32.mrb[43].mxu0  ;;  %943 = vst.msk [vmem:[#allocation2 + $0x30] sm:$0xff] %vm208_vm5, %v933_v62  ;;  %v1151_v5 = vadd.f32 %v1124_v58, %v962_v2  ;;  %v934_v6 = vadd.f32 %v915_v3, %v788_v49  ;;  %v2390_v7 = vpop.f32.mrb[43].mxu1 }
 0x13a   : > { %v963_v8 = vld [vmem:[#allocation2 + $0x28] sm:$0xff]  ;;  %v1180_v43 = vld [vmem:[#allocation2 + $0x10] sm:$0xff] }
 0x13b   : > { %1161 = vst.msk [vmem:[#allocation2 + $0x20] sm:$0xff] %vm208_vm5, %v1151_v5  ;;  %944 = vst.msk [vmem:[#allocation2 + $0x38] sm:$0xff] %vm208_vm5, %v934_v6  ;;  %v1152_v9 = vadd.f32 %v1127_v0, %v963_v8 }
 0x13c   : > { %v1181_v52 = vld [vmem:[#allocation2 + $0x18] sm:$0xff] }
 0x13d   : > { %1162 = vst.msk [vmem:[#allocation2 + $0x28] sm:$0xff] %vm208_vm5, %v1152_v9 }
 0x13e   : > { %v1132_v10 = vpop.f32.mrb[44].mxu0  ;;  %v920_v12 = vpop.f32.mrb[44].mxu1 }
 0x13f   : > { %v2411_v13 = vpop.f32.mrb[45].mxu0  ;;  %v935_v14 = vadd.f32 %v920_v12, %v789_v11  ;;  %v2393_v15 = vpop.f32.mrb[45].mxu1 }
 0x140   : > { %v1135_v16 = vpop.f32.mrb[46].mxu0  ;;  %v964_v17 = vld [vmem:[#allocation2 + $0x30] sm:$0xff]  ;;  %v923_v19 = vpop.f32.mrb[46].mxu1 }
 0x141   : > { %v2412_v20 = vpop.f32.mrb[47].mxu0  ;;  %945 = vst.msk [vmem:[#allocation2 + $0x40] sm:$0xff] %vm208_vm5, %v935_v14  ;;  %v1153_v21 = vadd.f32 %v1132_v10, %v964_v17  ;;  %v936_v22 = vadd.f32 %v923_v19, %v790_v18  ;;  %v2394_v23 = vpop.f32.mrb[47].mxu1 }
 0x142   : > { %v965_v24 = vld [vmem:[#allocation2 + $0x38] sm:$0xff]  ;;  %v1182_v59 = vld [vmem:[#allocation2 + $0x20] sm:$0xff] }
 0x143   : > { %1163 = vst.msk [vmem:[#allocation2 + $0x30] sm:$0xff] %vm208_vm5, %v1153_v21  ;;  %946 = vst.msk [vmem:[#allocation2 + $0x48] sm:$0xff] %vm208_vm5, %v936_v22  ;;  %v1154_v25 = vadd.f32 %v1135_v16, %v965_v24 }
 0x144   : > { %v1183_v49 = vld [vmem:[#allocation2 + $0x28] sm:$0xff] }
 0x145   : > { %1164 = vst.msk [vmem:[#allocation2 + $0x38] sm:$0xff] %vm208_vm5, %v1154_v25 }
 0x146   : > { %v1140_v26 = vpop.f32.mrb[48].mxu0  ;;  %v1286_v28 = vpop.f32.mrb[48].mxu1 }
 0x147   : > { %v2415_v29 = vpop.f32.mrb[49].mxu0  ;;  %v1325_v30 = vadd.f32 %v1286_v28, %v1178_v27  ;;  %v2421_v31 = vpop.f32.mrb[49].mxu1 }
 0x148   : > { %v1143_v32 = vpop.f32.mrb[50].mxu0  ;;  %v966_v33 = vld [vmem:[#allocation2 + $0x40] sm:$0xff]  ;;  %v1289_v35 = vpop.f32.mrb[50].mxu1 }
 0x149   : > { %v2416_v36 = vpop.f32.mrb[51].mxu0  ;;  %v1155_v37 = vadd.f32 %v1140_v26, %v966_v33  ;;  %1335 = vst.msk [vmem:[#allocation2] sm:$0xff] %vm208_vm5, %v1325_v30  ;;  %v1326_v1 = vadd.f32 %v1289_v35, %v1179_v34  ;;  %v2422_v38 = vpop.f32.mrb[51].mxu1 }
 0x14a   : > { %v967_v40 = vld [vmem:[#allocation2 + $0x48] sm:$0xff]  ;;  %v1184_v11 = vld [vmem:[#allocation2 + $0x30] sm:$0xff] }
 0x14b   : > { %1165 = vst.msk [vmem:[#allocation2 + $0x40] sm:$0xff] %vm208_vm5, %v1155_v37  ;;  %v1156_v41 = vadd.f32 %v1143_v32, %v967_v40  ;;  %1336 = vst.msk [vmem:[#allocation2 + $0x8] sm:$0xff] %vm208_vm5, %v1326_v1 }
 0x14c   : > { %v1185_v18 = vld [vmem:[#allocation2 + $0x38] sm:$0xff] }
 0x14d   : > { %1166 = vst.msk [vmem:[#allocation2 + $0x48] sm:$0xff] %vm208_vm5, %v1156_v41 }
 0x14e   : > { %v1463_v42 = vpop.f32.mrb[52].mxu0  ;;  %v1294_v44 = vpop.f32.mrb[52].mxu1 }
 0x14f   : > { %v2443_v45 = vpop.f32.mrb[53].mxu0  ;;  %v1327_v47 = vadd.f32 %v1294_v44, %v1180_v43  ;;  %v2425_v48 = vpop.f32.mrb[53].mxu1 }
 0x150   : > { %v1466_v50 = vpop.f32.mrb[54].mxu0  ;;  %v1356_v51 = vld [vmem:[#allocation2] sm:$0xff]  ;;  %v1297_v53 = vpop.f32.mrb[54].mxu1 }
 0x151   : > { %v2444_v54 = vpop.f32.mrb[55].mxu0  ;;  %1337 = vst.msk [vmem:[#allocation2 + $0x10] sm:$0xff] %vm208_vm5, %v1327_v47  ;;  %v1502_v55 = vadd.f32 %v1463_v42, %v1356_v51  ;;  %v1328_v56 = vadd.f32 %v1297_v53, %v1181_v52  ;;  %v2426_v39 = vpop.f32.mrb[55].mxu1 }
 0x152   : > { %v1357_v57 = vld [vmem:[#allocation2 + $0x8] sm:$0xff]  ;;  %v1186_v27 = vld [vmem:[#allocation2 + $0x40] sm:$0xff] }
 0x153   : > { %1512 = vst.msk [vmem:[#allocation2] sm:$0xff] %vm208_vm5, %v1502_v55  ;;  %1338 = vst.msk [vmem:[#allocation2 + $0x18] sm:$0xff] %vm208_vm5, %v1328_v56  ;;  %v1503_v46 = vadd.f32 %v1466_v50, %v1357_v57 }
 0x154   : > { %v1187_v34 = vld [vmem:[#allocation2 + $0x48] sm:$0xff] }
 0x155   : > { %1513 = vst.msk [vmem:[#allocation2 + $0x8] sm:$0xff] %vm208_vm5, %v1503_v46 }
 0x156   : > { %v1471_v58 = vpop.f32.mrb[56].mxu0  ;;  %v1302_v60 = vpop.f32.mrb[56].mxu1 }
 0x157   : > { %v2447_v61 = vpop.f32.mrb[57].mxu0  ;;  %v1329_v62 = vadd.f32 %v1302_v60, %v1182_v59  ;;  %v2429_v63 = vpop.f32.mrb[57].mxu1 }
 0x158   : > { %v1474_v0 = vpop.f32.mrb[58].mxu0  ;;  %v1358_v2 = vld [vmem:[#allocation2 + $0x10] sm:$0xff]  ;;  %v1305_v3 = vpop.f32.mrb[58].mxu1 }
 0x159   : > { %v2448_v4 = vpop.f32.mrb[59].mxu0  ;;  %1339 = vst.msk [vmem:[#allocation2 + $0x20] sm:$0xff] %vm208_vm5, %v1329_v62  ;;  %v1504_v5 = vadd.f32 %v1471_v58, %v1358_v2  ;;  %v1330_v6 = vadd.f32 %v1305_v3, %v1183_v49  ;;  %v2430_v7 = vpop.f32.mrb[59].mxu1 }
 0x15a   : > { %v1359_v8 = vld [vmem:[#allocation2 + $0x18] sm:$0xff]  ;;  %v1533_v43 = vld [vmem:[#allocation2] sm:$0xff] }
 0x15b   : > { %1514 = vst.msk [vmem:[#allocation2 + $0x10] sm:$0xff] %vm208_vm5, %v1504_v5  ;;  %1340 = vst.msk [vmem:[#allocation2 + $0x28] sm:$0xff] %vm208_vm5, %v1330_v6  ;;  %v1505_v9 = vadd.f32 %v1474_v0, %v1359_v8 }
 0x15c   : > { %v1534_v52 = vld [vmem:[#allocation2 + $0x8] sm:$0xff] }
 0x15d   : > { %1515 = vst.msk [vmem:[#allocation2 + $0x18] sm:$0xff] %vm208_vm5, %v1505_v9 }
 0x15e   : > { %v1479_v10 = vpop.f32.mrb[60].mxu0  ;;  %v1310_v12 = vpop.f32.mrb[60].mxu1 }
 0x15f   : > { %v2451_v13 = vpop.f32.mrb[61].mxu0  ;;  %v1331_v14 = vadd.f32 %v1310_v12, %v1184_v11  ;;  %v2433_v15 = vpop.f32.mrb[61].mxu1 }
 0x160   : > { %v1482_v16 = vpop.f32.mrb[62].mxu0  ;;  %v1360_v17 = vld [vmem:[#allocation2 + $0x20] sm:$0xff]  ;;  %v1313_v19 = vpop.f32.mrb[62].mxu1 }
 0x161   : > { %v2452_v20 = vpop.f32.mrb[63].mxu0  ;;  %1341 = vst.msk [vmem:[#allocation2 + $0x30] sm:$0xff] %vm208_vm5, %v1331_v14  ;;  %v1506_v21 = vadd.f32 %v1479_v10, %v1360_v17  ;;  %v1332_v22 = vadd.f32 %v1313_v19, %v1185_v18  ;;  %v2434_v23 = vpop.f32.mrb[63].mxu1  ;;  %v3043_v17 = vld [vmem:[%s3106_s2] ss:$0 sm:$0xff] }
 0x162   : > { %v1361_v24 = vld [vmem:[#allocation2 + $0x28] sm:$0xff]  ;;  %v1535_v59 = vld [vmem:[#allocation2 + $0x10] sm:$0xff] }
 0x163   : > { %1516 = vst.msk [vmem:[#allocation2 + $0x20] sm:$0xff] %vm208_vm5, %v1506_v21  ;;  %1342 = vst.msk [vmem:[#allocation2 + $0x38] sm:$0xff] %vm208_vm5, %v1332_v22  ;;  %v1507_v25 = vadd.f32 %v1482_v16, %v1361_v24 }
 0x164   : > { %v1536_v49 = vld [vmem:[#allocation2 + $0x18] sm:$0xff] }
 0x165   : > { %1517 = vst.msk [vmem:[#allocation2 + $0x28] sm:$0xff] %vm208_vm5, %v1507_v25 }
 0x166   : > { %v1487_v26 = vpop.f32.mrb[64].mxu0  ;;  %v1318_v28 = vpop.f32.mrb[64].mxu1 }
 0x167   : > { %v2455_v29 = vpop.f32.mrb[65].mxu0  ;;  %v1333_v30 = vadd.f32 %v1318_v28, %v1186_v27  ;;  %v2437_v31 = vpop.f32.mrb[65].mxu1 }
 0x168   : > { %v1490_v32 = vpop.f32.mrb[66].mxu0  ;;  %v1362_v33 = vld [vmem:[#allocation2 + $0x30] sm:$0xff]  ;;  %v1321_v35 = vpop.f32.mrb[66].mxu1 }
 0x169   : > { %v2456_v36 = vpop.f32.mrb[67].mxu0  ;;  %1343 = vst.msk [vmem:[#allocation2 + $0x40] sm:$0xff] %vm208_vm5, %v1333_v30  ;;  %v1508_v37 = vadd.f32 %v1487_v26, %v1362_v33  ;;  %v1334_v1 = vadd.f32 %v1321_v35, %v1187_v34  ;;  %v2438_v38 = vpop.f32.mrb[67].mxu1 }
 0x16a   : > { %v1363_v40 = vld [vmem:[#allocation2 + $0x38] sm:$0xff]  ;;  %v1537_v11 = vld [vmem:[#allocation2 + $0x20] sm:$0xff] }
 0x16b   : > { %1518 = vst.msk [vmem:[#allocation2 + $0x30] sm:$0xff] %vm208_vm5, %v1508_v37  ;;  %1344 = vst.msk [vmem:[#allocation2 + $0x48] sm:$0xff] %vm208_vm5, %v1334_v1  ;;  %v1509_v41 = vadd.f32 %v1490_v32, %v1363_v40 }
 0x16c   : > { %v1538_v19 = vld [vmem:[#allocation2 + $0x28] sm:$0xff] }
 0x16d   : > { %1519 = vst.msk [vmem:[#allocation2 + $0x38] sm:$0xff] %vm208_vm5, %v1509_v41 }
 0x16e   : > { %v1495_v42 = vpop.f32.mrb[68].mxu0  ;;  %v1683_v44 = vpop.f32.mrb[68].mxu1 }
 0x16f   : > { %v2459_v45 = vpop.f32.mrb[69].mxu0  ;;  %v1722_v47 = vadd.f32 %v1683_v44, %v1533_v43  ;;  %v2465_v48 = vpop.f32.mrb[69].mxu1 }
 0x170   : > { %v1498_v50 = vpop.f32.mrb[70].mxu0  ;;  %v1364_v51 = vld [vmem:[#allocation2 + $0x40] sm:$0xff]  ;;  %v1686_v53 = vpop.f32.mrb[70].mxu1 }
 0x171   : > { %v2460_v54 = vpop.f32.mrb[71].mxu0  ;;  %v1510_v55 = vadd.f32 %v1495_v42, %v1364_v51  ;;  %1732 = vst.msk [vmem:[#allocation2] sm:$0xff] %vm208_vm5, %v1722_v47  ;;  %v1723_v56 = vadd.f32 %v1686_v53, %v1534_v52  ;;  %v2466_v39 = vpop.f32.mrb[71].mxu1 }
 0x172   : > { %v1365_v57 = vld [vmem:[#allocation2 + $0x48] sm:$0xff]  ;;  %v1539_v33 = vld [vmem:[#allocation2 + $0x30] sm:$0xff] }
 0x173   : > { %1520 = vst.msk [vmem:[#allocation2 + $0x40] sm:$0xff] %vm208_vm5, %v1510_v55  ;;  %v1511_v46 = vadd.f32 %v1498_v50, %v1365_v57  ;;  %1733 = vst.msk [vmem:[#allocation2 + $0x8] sm:$0xff] %vm208_vm5, %v1723_v56 }
 0x174   : > { %v1540_v42 = vld [vmem:[#allocation2 + $0x38] sm:$0xff] }
 0x175   : > { %1521 = vst.msk [vmem:[#allocation2 + $0x48] sm:$0xff] %vm208_vm5, %v1511_v46 }
 0x176   : > { %v1861_v58 = vpop.f32.mrb[72].mxu0  ;;  %v1691_v60 = vpop.f32.mrb[72].mxu1 }
 0x177   : > { %v2487_v61 = vpop.f32.mrb[73].mxu0  ;;  %v1724_v62 = vadd.f32 %v1691_v60, %v1535_v59  ;;  %v2469_v63 = vpop.f32.mrb[73].mxu1 }
 0x178   : > { %v1864_v0 = vpop.f32.mrb[74].mxu0  ;;  %v1753_v2 = vld [vmem:[#allocation2] sm:$0xff]  ;;  %v1694_v3 = vpop.f32.mrb[74].mxu1 }
 0x179   : > { %v2488_v4 = vpop.f32.mrb[75].mxu0  ;;  %1734 = vst.msk [vmem:[#allocation2 + $0x10] sm:$0xff] %vm208_vm5, %v1724_v62  ;;  %v1900_v5 = vadd.f32 %v1861_v58, %v1753_v2  ;;  %v1725_v6 = vadd.f32 %v1694_v3, %v1536_v49  ;;  %v2470_v7 = vpop.f32.mrb[75].mxu1 }
 0x17a   : > { %v1754_v8 = vld [vmem:[#allocation2 + $0x8] sm:$0xff]  ;;  %v1541_v46 = vld [vmem:[#allocation2 + $0x40] sm:$0xff] }
 0x17b   : > { %1910 = vst.msk [vmem:[#allocation2] sm:$0xff] %vm208_vm5, %v1900_v5  ;;  %1735 = vst.msk [vmem:[#allocation2 + $0x18] sm:$0xff] %vm208_vm5, %v1725_v6  ;;  %v1901_v9 = vadd.f32 %v1864_v0, %v1754_v8 }
 0x17c   : > { %v1542_v49 = vld [vmem:[#allocation2 + $0x48] sm:$0xff] }
 0x17d   : > { %1911 = vst.msk [vmem:[#allocation2 + $0x8] sm:$0xff] %vm208_vm5, %v1901_v9 }
 0x17e   : > { %v1869_v10 = vpop.f32.mrb[76].mxu0  ;;  %v1699_v12 = vpop.f32.mrb[76].mxu1 }
 0x17f   : > { %v2491_v13 = vpop.f32.mrb[77].mxu0  ;;  %v1726_v14 = vadd.f32 %v1699_v12, %v1537_v11  ;;  %v2473_v15 = vpop.f32.mrb[77].mxu1 }
 0x180   : > { %v1872_v16 = vpop.f32.mrb[78].mxu0  ;;  %v1755_v18 = vld [vmem:[#allocation2 + $0x10] sm:$0xff]  ;;  %v1702_v20 = vpop.f32.mrb[78].mxu1 }
 0x181   : > { %v2492_v21 = vpop.f32.mrb[79].mxu0  ;;  %1736 = vst.msk [vmem:[#allocation2 + $0x20] sm:$0xff] %vm208_vm5, %v1726_v14  ;;  %v1902_v22 = vadd.f32 %v1869_v10, %v1755_v18  ;;  %v1727_v23 = vadd.f32 %v1702_v20, %v1538_v19  ;;  %v2474_v24 = vpop.f32.mrb[79].mxu1 }
 0x182   : > { %v1920_v25 = vld [vmem:[#allocation2] sm:$0xff]  ;;  %v1756_v26 = vld [vmem:[#allocation2 + $0x18] sm:$0xff] }
 0x183   : > { %v1937_v27 = vadd.f32 %v3043_v17, %v1920_v25  ;;  %1912 = vst.msk [vmem:[#allocation2 + $0x10] sm:$0xff] %vm208_vm5, %v1902_v22  ;;  %1737 = vst.msk [vmem:[#allocation2 + $0x28] sm:$0xff] %vm208_vm5, %v1727_v23  ;;  %v1903_v28 = vadd.f32 %v1872_v16, %v1756_v26 }
 0x184   : > { %v1921_v29 = vld [vmem:[#allocation2 + $0x8] sm:$0xff] }
 0x185   : > { %v1947_v30 = vmax.f32 %v1937_v27, 0.0  ;;  %v1938_v31 = vadd.f32 %v3043_v17, %v1921_v29  ;;  %1913 = vst.msk [vmem:[#allocation2 + $0x18] sm:$0xff] %vm208_vm5, %v1903_v28 }
 0x186   : > { %v1877_v32 = vpop.f32.mrb[80].mxu0  ;;  %v1707_v34 = vpop.f32.mrb[80].mxu1 }
 0x187   : > { %v2495_v35 = vpop.f32.mrb[81].mxu0  ;;  %v2243_v36 = vpack.c.bf16 %v1947_v30, %v1947_v30  ;;  %v1948_v37 = vmax.f32 %v1938_v31, 0.0  ;;  %v1728_v1 = vadd.f32 %v1707_v34, %v1539_v33  ;;  %v2477_v38 = vpop.f32.mrb[81].mxu1 }
 0x188   : > { %v1880_v40 = vpop.f32.mrb[82].mxu0  ;;  %v1757_v41 = vld [vmem:[#allocation2 + $0x20] sm:$0xff]  ;;  %v1710_v43 = vpop.f32.mrb[82].mxu1 }
 0x189   : > { %v2496_v44 = vpop.f32.mrb[83].mxu0  ;;  %1998 = vst.msk [vmem:[%s3055_s12] sm:$0xf] %vm1997_vm9, %v2243_v36  ;;  %v2244_v45 = vpack.c.bf16 %v1948_v37, %v1948_v37  ;;  %v1904_v47 = vadd.f32 %v1877_v32, %v1757_v41  ;;  %v1729_v48 = vadd.f32 %v1710_v43, %v1540_v42  ;;  %v2478_v50 = vpop.f32.mrb[83].mxu1 }
 0x18a   : > { %1738 = vst.msk [vmem:[#allocation2 + $0x30] sm:$0xff] %vm208_vm5, %v1728_v1  ;;  %v1922_v51 = vld [vmem:[#allocation2 + $0x10] sm:$0xff]  ;;  %v1758_v52 = vld [vmem:[#allocation2 + $0x28] sm:$0xff] }
 0x18b   : > { %1999 = vst.msk [vmem:[%s3055_s12 + $0x4] sm:$0xf] %vm1997_vm9, %v2244_v45  ;;  %v1939_v53 = vadd.f32 %v3043_v17, %v1922_v51  ;;  %v1905_v54 = vadd.f32 %v1880_v40, %v1758_v52 }
 0x18c   : > { %1914 = vst.msk [vmem:[#allocation2 + $0x20] sm:$0xff] %vm208_vm5, %v1904_v47  ;;  %1739 = vst.msk [vmem:[#allocation2 + $0x38] sm:$0xff] %vm208_vm5, %v1729_v48  ;;  %v1923_v55 = vld [vmem:[#allocation2 + $0x18] sm:$0xff] }
 0x18d   : > { %v1949_v56 = vmax.f32 %v1939_v53, 0.0  ;;  %v1940_v39 = vadd.f32 %v3043_v17, %v1923_v55  ;;  %1915 = vst.msk [vmem:[#allocation2 + $0x28] sm:$0xff] %vm208_vm5, %v1905_v54 }
 0x18e   : > { %v1885_v57 = vpop.f32.mrb[84].mxu0  ;;  %v1715_v58 = vpop.f32.mrb[84].mxu1 }
 0x18f   : > { %v2499_v59 = vpop.f32.mrb[85].mxu0  ;;  %v2245_v60 = vpack.c.bf16 %v1949_v56, %v1949_v56  ;;  %v1950_v61 = vmax.f32 %v1940_v39, 0.0  ;;  %v1730_v62 = vadd.f32 %v1715_v58, %v1541_v46  ;;  %v2481_v63 = vpop.f32.mrb[85].mxu1 }
 0x190   : > { %v1888_v0 = vpop.f32.mrb[86].mxu0  ;;  %v1718_v3 = vpop.f32.mrb[86].mxu1 }
 0x191   : > { %v1759_v2 = vld [vmem:[#allocation2 + $0x30] sm:$0xff]  ;;  %v2500_v4 = vpop.f32.mrb[87].mxu0  ;;  %2000 = vst.msk [vmem:[%s3055_s12 + $0x8] sm:$0xf] %vm1997_vm9, %v2245_v60  ;;  %v2246_v5 = vpack.c.bf16 %v1950_v61, %v1950_v61  ;;  %v1731_v7 = vadd.f32 %v1718_v3, %v1542_v49  ;;  %v2482_v8 = vpop.f32.mrb[87].mxu1 }
 0x192   : > { %1740 = vst.msk [vmem:[#allocation2 + $0x40] sm:$0xff] %vm208_vm5, %v1730_v62  ;;  %v1906_v6 = vadd.f32 %v1885_v57, %v1759_v2 }
 0x193   : > { %v1924_v9 = vld [vmem:[#allocation2 + $0x20] sm:$0xff]  ;;  %v1760_v10 = vld [vmem:[#allocation2 + $0x38] sm:$0xff]  ;;  %2001 = vst.msk [vmem:[%s3055_s12 + $0xc] sm:$0xf] %vm1997_vm9, %v2246_v5 }
 0x194   : > { %v1941_v11 = vadd.f32 %v3043_v17, %v1924_v9  ;;  %1916 = vst.msk [vmem:[#allocation2 + $0x30] sm:$0xff] %vm208_vm5, %v1906_v6  ;;  %1741 = vst.msk [vmem:[#allocation2 + $0x48] sm:$0xff] %vm208_vm5, %v1731_v7  ;;  %v1907_v12 = vadd.f32 %v1888_v0, %v1760_v10  ;;  %v1925_v13 = vld [vmem:[#allocation2 + $0x28] sm:$0xff] }
 0x195   : > { %v1942_v15 = vadd.f32 %v3043_v17, %v1925_v13 }
 0x196   : > { %v1951_v14 = vmax.f32 %v1941_v11, 0.0  ;;  %1917 = vst.msk [vmem:[#allocation2 + $0x38] sm:$0xff] %vm208_vm5, %v1907_v12  ;;  %v1893_v16 = vpop.f32.mrb[88].mxu0 }
 0x197   : > { %v2503_v18 = vpop.f32.mrb[89].mxu0  ;;  %v1952_v20 = vmax.f32 %v1942_v15, 0.0 }
 0x198   : > { %v2247_v19 = vpack.c.bf16 %v1951_v14, %v1951_v14  ;;  %v1896_v21 = vpop.f32.mrb[90].mxu0 }
 0x199   : > { %v1761_v22 = vld [vmem:[#allocation2 + $0x40] sm:$0xff]  ;;  %v2504_v23 = vpop.f32.mrb[91].mxu0  ;;  %v2248_v24 = vpack.c.bf16 %v1952_v20, %v1952_v20 }
 0x19a   : > { %2002 = vst.msk [vmem:[%s3055_s12 + $0x10] sm:$0xf] %vm1997_vm9, %v2247_v19  ;;  %v1908_v25 = vadd.f32 %v1893_v16, %v1761_v22 }
 0x19b   : > { %v1926_v26 = vld [vmem:[#allocation2 + $0x30] sm:$0xff]  ;;  %v1762_v27 = vld [vmem:[#allocation2 + $0x48] sm:$0xff]  ;;  %2003 = vst.msk [vmem:[%s3055_s12 + $0x14] sm:$0xf] %vm1997_vm9, %v2248_v24 }
 0x19c   : > { %v1943_v28 = vadd.f32 %v3043_v17, %v1926_v26  ;;  %1918 = vst.msk [vmem:[#allocation2 + $0x40] sm:$0xff] %vm208_vm5, %v1908_v25  ;;  %v1909_v29 = vadd.f32 %v1896_v21, %v1762_v27 }
 0x19d   : > { %v1927_v30 = vld [vmem:[#allocation2 + $0x38] sm:$0xff] }
 0x19e   : > { %v1953_v31 = vmax.f32 %v1943_v28, 0.0  ;;  %v1944_v32 = vadd.f32 %v3043_v17, %v1927_v30  ;;  %1919 = vst.msk [vmem:[#allocation2 + $0x48] sm:$0xff] %vm208_vm5, %v1909_v29 }
 0x1a0   : > { %v2249_v33 = vpack.c.bf16 %v1953_v31, %v1953_v31  ;;  %v1954_v34 = vmax.f32 %v1944_v32, 0.0 }
 0x1a2   : > { %2004 = vst.msk [vmem:[%s3055_s12 + $0x18] sm:$0xf] %vm1997_vm9, %v2249_v33  ;;  %v2250_v35 = vpack.c.bf16 %v1954_v34, %v1954_v34 }
 0x1a3   : > { %v1928_v36 = vld [vmem:[#allocation2 + $0x40] sm:$0xff] }
 0x1a4   : > { %2005 = vst.msk [vmem:[%s3055_s12 + $0x1c] sm:$0xf] %vm1997_vm9, %v2250_v35  ;;  %v1945_v37 = vadd.f32 %v3043_v17, %v1928_v36 }
 0x1a5   : > { %v1929_v1 = vld [vmem:[#allocation2 + $0x48] sm:$0xff] }
 0x1a6   : > { %v1955_v38 = vmax.f32 %v1945_v37, 0.0  ;;  %v1946_v40 = vadd.f32 %v3043_v17, %v1929_v1 }
 0x1a8   : > { %v2251_v41 = vpack.c.bf16 %v1955_v38, %v1955_v38  ;;  %v1956_v42 = vmax.f32 %v1946_v40, 0.0 }
 0x1aa   : > { %2006 = vst.msk [vmem:[%s3055_s12 + $0x20] sm:$0xf] %vm1997_vm9, %v2251_v41  ;;  %v2252_v43 = vpack.c.bf16 %v1956_v42, %v1956_v42 }
 0x1ac   : > { %2007 = vst.msk [vmem:[%s3055_s12 + $0x24] sm:$0xf] %vm1997_vm9, %v2252_v43 }
 0x1ad PF: > { %s13_s14 = sadd.s32 1, %s2619_s14   ;;  %s3108_s12 = smov %s2615_s13 }
 0x1ae   : > { %p10_p5 = scmp.ge.s32.totalorder %s13_s14, 4   ;;  %s3109_s13 = smov %s3111_s15 }
 0x1b0   :  { %12 = sbr.rel (!%p10_p5) target bundleno = 2 (0x2), region = 70 }

</bundles_post_ra>
